<compile_context>
chip_gen: v7x
topology: tpu7x:2x2x1
jax: 0.10.0
libtpu: 0.0.40
codegen_flags: <defaults>
</compile_context>

<pallas_src>
import functools
import math

import jax
import jax.numpy as jnp
import numpy as np
from jax.experimental import pallas as pl
from jax.experimental.pallas import tpu as pltpu

NUM_HEADS = 4
LN_EPS = 1e-6


def _layernorm(v, g, b):
    # Annotated-Transformer LayerNorm: a2*(x-mean)/(std+eps)+b2, std unbiased (N-1)
    d = v.shape[-1]
    mu = jnp.mean(v, axis=-1, keepdims=True)
    diff = v - mu
    var = jnp.sum(diff * diff, axis=-1, keepdims=True) * (1.0 / (d - 1))
    inv = pl.reciprocal(jnp.sqrt(var) + LN_EPS, approx=True)   # EUP slot, off the VALU
    return g * (diff * inv) + b


def encoder_layer_kernel(x_ref, m_ref,
                         ln1g_ref, ln1b_ref,
                         wqkv_ref, bqkv_ref, wo_ref, bo_ref,
                         ln2g_ref, ln2b_ref,
                         w1_ref, b1_ref, w2_ref, b2_ref,
                         o_ref, pv_ref, *, num_heads):
    Bb, S, D = x_ref.shape
    dk = D // num_heads
    rows = Bb * S

    x = x_ref[...].astype(jnp.float32).reshape(rows, D)     # merge leading dims
    # Additive mask bias, computed ONCE (not re-emitted per head).
    mbias = jnp.where(m_ref[...] > 0, 0.0, -1e9).astype(jnp.float32)   # (Bb, 1, S)

    # ---------------- sublayer 0: pre-norm multi-head self-attention ----------------
    xn = _layernorm(x, ln1g_ref[...], ln1b_ref[...]).astype(jnp.bfloat16)

    # One lane-dense N=3D projection (Q|K|V packed host-side; 1/sqrt(dk) folded
    # into the Q columns/bias).  f32 accumulation, single fused bias add.
    qkv = jnp.dot(xn, wqkv_ref[...], preferred_element_type=jnp.float32) + bqkv_ref[...]
    qkv = qkv.astype(jnp.bfloat16)                           # bf16 operands for score/PV

    # Static unroll over heads; per-head score buffers die each iteration since
    # only pv (written into pv_ref) escapes.  At production D=512 (dk=128) the
    # per-head column slices are 128-lane aligned and never cross an (8,128) tile.
    for h in range(num_heads):
        q3 = qkv[:, h * dk:(h + 1) * dk].reshape(Bb, S, dk)
        k3 = qkv[:, D + h * dk:D + (h + 1) * dk].reshape(Bb, S, dk)
        v3 = qkv[:, 2 * D + h * dk:2 * D + (h + 1) * dk].reshape(Bb, S, dk)
        s = jnp.einsum("bqd,bkd->bqk", q3, k3,
                       preferred_element_type=jnp.float32) + mbias
        s = s - jnp.max(s, axis=-1, keepdims=True)
        p = jnp.exp(s)                                       # un-normalized probs
        denom = jnp.sum(p, axis=-1, keepdims=True)           # (Bb, S, 1) f32
        pv = jnp.einsum("bqk,bkd->bqd", p.astype(jnp.bfloat16), v3,
                        preferred_element_type=jnp.float32)  # (Bb, S, dk)
        # Normalize pv (dk lanes) instead of p (S lanes): fewer VPU ops.
        pv = pv * pl.reciprocal(denom, approx=True)
        # Write this head's output into its lane columns of the bf16 scratch.
        pv_ref[:, h * dk:(h + 1) * dk] = pv.reshape(rows, dk).astype(jnp.bfloat16)

    # Single K=D output projection with the unsplit Wo.
    attn = jnp.dot(pv_ref[...], wo_ref[...],
                   preferred_element_type=jnp.float32) + bo_ref[...]
    # TODO(synk): dropout omitted (eval mode / p=0) — no stochastic masking applied.
    y1 = x + attn

    # ---------------- sublayer 1: pre-norm position-wise feed-forward ----------------
    xn2 = _layernorm(y1, ln2g_ref[...], ln2b_ref[...]).astype(jnp.bfloat16)
    h1 = jnp.maximum(
        jnp.dot(xn2, w1_ref[...], preferred_element_type=jnp.float32) + b1_ref[...], 0.0)
    ffn = jnp.dot(h1.astype(jnp.bfloat16), w2_ref[...],
                  preferred_element_type=jnp.float32) + b2_ref[...]
    o_ref[...] = (y1 + ffn).reshape(Bb, S, D).astype(o_ref.dtype)


def _tpu_settings():
    """Generation-aware block/VMEM budget: big blocks on 128-MiB parts (v5e/v6e),
    conservative on 64-MiB v7x (also the fallback if detection is unavailable)."""
    vmem_cap = None
    try:
        vmem_cap = pltpu.get_tpu_info().vmem_capacity_bytes
    except Exception:
        pass
    if vmem_cap is not None and vmem_cap >= 100 * 1024 * 1024:
        # v5e / v6e: 128 MiB VMEM, 1 TensorCore per chip.
        return {"target_rows": 2048, "min_steps": 2,
                "vmem_limit": 100 * 1024 * 1024}
    # v7x (64 MiB, 2 TensorCores) or unknown.
    return {"target_rows": 512, "min_steps": 4,
            "vmem_limit": 48 * 1024 * 1024}


def _pick_block_b(B, S, target_rows, min_steps):
    """Largest divisor of B with block_b*S <= target_rows, preferring at least
    `min_steps` grid steps (>=2 per TensorCore) so input DMA / output writeback
    can be hidden behind neighbouring steps."""
    divisors = [d for d in range(1, B + 1) if B % d == 0 and d * S <= target_rows]
    if not divisors:
        return 1
    eff_min = min(min_steps, B)
    pipelined = [d for d in divisors if B // d >= eff_min]
    pool = pipelined if pipelined else divisors
    return max(pool)


def prepare_params(p, num_heads=NUM_HEADS):
    """One-time host-side prep: fold 1/sqrt(dk) into the Q columns/bias, pack
    Q|K|V weights into one (D, 3D) lane-dense matrix (and (1, 3D) bias), cast
    matmul weights to bf16.  Wo stays unsplit (single K=D projection)."""
    D = p["wq"].shape[0]
    dk = D // num_heads
    scale = 1.0 / math.sqrt(dk)
    wqkv = jnp.concatenate([p["wq"] * scale, p["wk"], p["wv"]], axis=1)
    bqkv = jnp.concatenate([p["bq"] * scale, p["bk"], p["bv"]], axis=1)
    return {
        "ln1_g": p["ln1_g"], "ln1_b": p["ln1_b"],
        "ln2_g": p["ln2_g"], "ln2_b": p["ln2_b"],
        "wqkv": wqkv.astype(jnp.bfloat16), "bqkv": bqkv.astype(jnp.float32),
        "wo": p["wo"].astype(jnp.bfloat16), "bo": p["bo"],
        "w1": p["w1"].astype(jnp.bfloat16), "b1": p["b1"],
        "w2": p["w2"].astype(jnp.bfloat16), "b2": p["b2"],
    }


def encoder_layer(x, mask, prepped, *, num_heads=NUM_HEADS, block_b=None):
    B, S, D = x.shape
    Dff = prepped["w1"].shape[1]
    cfg = _tpu_settings()
    if block_b is None:
        block_b = _pick_block_b(B, S, cfg["target_rows"], cfg["min_steps"])
    assert B % block_b == 0

    def act_spec(shape):
        return pl.BlockSpec(shape, lambda b: (b, 0, 0))

    def wspec(shape):
        # Grid-invariant weights: constant index_map, not re-DMA'd across steps.
        return pl.BlockSpec(shape, lambda b, _n=len(shape): (0,) * _n)

    in_specs = [
        act_spec((block_b, S, D)),           # x
        act_spec((block_b, 1, S)),           # mask
        wspec((1, D)), wspec((1, D)),        # ln1 gamma/beta
        wspec((D, 3 * D)), wspec((1, 3 * D)),   # packed Wqkv (Q scaled), bqkv
        wspec((D, D)), wspec((1, D)),           # Wo, bo
        wspec((1, D)), wspec((1, D)),           # ln2 gamma/beta
        wspec((D, Dff)), wspec((1, Dff)),       # W1, b1
        wspec((Dff, D)), wspec((1, D)),         # W2, b2
    ]
    out_spec = act_spec((block_b, S, D))

    kernel = functools.partial(encoder_layer_kernel, num_heads=num_heads)
    return pl.pallas_call(
        kernel,
        out_shape=jax.ShapeDtypeStruct((B, S, D), x.dtype),
        grid=(B // block_b,),
        in_specs=in_specs,
        out_specs=out_spec,
        scratch_shapes=[pltpu.VMEM((block_b * S, D), jnp.bfloat16)],  # per-head pv slab
        compiler_params=pltpu.CompilerParams(
            dimension_semantics=("parallel",),
            vmem_limit_bytes=cfg["vmem_limit"],
        ),
    )(x, mask,
      prepped["ln1_g"], prepped["ln1_b"],
      prepped["wqkv"], prepped["bqkv"], prepped["wo"], prepped["bo"],
      prepped["ln2_g"], prepped["ln2_b"],
      prepped["w1"], prepped["b1"], prepped["w2"], prepped["b2"])


# ------------------------- plain-JAX reference (for checking) -------------------------
def encoder_layer_ref(x, mask, params):
    def ln(v, g, b):
        d = v.shape[-1]
        mu = jnp.mean(v, -1, keepdims=True)
        diff = v - mu
        std = jnp.sqrt(jnp.sum(diff * diff, -1, keepdims=True) / (d - 1))
        return g * diff / (std + LN_EPS) + b

    B, S, D = x.shape
    dk = D // NUM_HEADS
    xn = ln(x, params["ln1_g"], params["ln1_b"])
    q = xn @ params["wq"] + params["bq"]
    k = xn @ params["wk"] + params["bk"]
    v = xn @ params["wv"] + params["bv"]
    q = q.reshape(B, S, NUM_HEADS, dk).transpose(0, 2, 1, 3)
    k = k.reshape(B, S, NUM_HEADS, dk).transpose(0, 2, 1, 3)
    v = v.reshape(B, S, NUM_HEADS, dk).transpose(0, 2, 1, 3)
    scores = jnp.einsum("bhqd,bhkd->bhqk", q, k) / math.sqrt(dk)
    scores = jnp.where(mask[:, None, :, :] > 0, scores, -1e9)
    p = jax.nn.softmax(scores, axis=-1)
    attn = jnp.einsum("bhqk,bhkd->bhqd", p, v).transpose(0, 2, 1, 3).reshape(B, S, D)
    attn = attn @ params["wo"] + params["bo"]
    y1 = x + attn
    xn2 = ln(y1, params["ln2_g"], params["ln2_b"])
    ffn = jnp.maximum(xn2 @ params["w1"] + params["b1"], 0.0) @ params["w2"] + params["b2"]
    return y1 + ffn


def make_params(key, D, Dff):
    ks = jax.random.split(key, 8)
    s = 0.02
    return {
        "ln1_g": jnp.ones((1, D), jnp.float32),
        "ln1_b": jnp.zeros((1, D), jnp.float32),
        "ln2_g": jnp.ones((1, D), jnp.float32),
        "ln2_b": jnp.zeros((1, D), jnp.float32),
        "wq": s * jax.random.normal(ks[0], (D, D), jnp.float32),
        "bq": jnp.zeros((1, D), jnp.float32),
        "wk": s * jax.random.normal(ks[1], (D, D), jnp.float32),
        "bk": jnp.zeros((1, D), jnp.float32),
        "wv": s * jax.random.normal(ks[2], (D, D), jnp.float32),
        "bv": jnp.zeros((1, D), jnp.float32),
        "wo": s * jax.random.normal(ks[3], (D, D), jnp.float32),
        "bo": jnp.zeros((1, D), jnp.float32),
        "w1": s * jax.random.normal(ks[4], (D, Dff), jnp.float32),
        "b1": jnp.zeros((1, Dff), jnp.float32),
        "w2": s * jax.random.normal(ks[5], (Dff, D), jnp.float32),
        "b2": jnp.zeros((1, D), jnp.float32),
    }


if __name__ == "__main__":
    B, S, D, Dff = 2, 8, 32, 64
    key = jax.random.PRNGKey(0)
    kx, kp = jax.random.split(key)
    x = jax.random.normal(kx, (B, S, D), jnp.float32)
    # valid-length mask: batch 0 fully valid, batch 1 has the last 3 positions masked
    lengths = jnp.array([S, S - 3], jnp.int32)
    mask = (jnp.arange(S)[None, None, :] < lengths[:, None, None]).astype(jnp.float32)
    params = make_params(kp, D, Dff)
    prepped = prepare_params(params)      # one-time host-side weight packing (bf16, fused QKV)

    out = encoder_layer(x, mask, prepped)
    out = jax.block_until_ready(out)

    ref = encoder_layer_ref(x, mask, params)
    # bf16 matmul operands + approx reciprocals -> looser tolerance than pure f32
    np.testing.assert_allclose(np.asarray(out), np.asarray(ref), rtol=2e-2, atol=2e-2)
    print("KERNEL_OK")
</pallas_src>

<mosaic_0001>
module attributes {stable_mosaic.version = 11 : i64} {
  func.func @encoder_layer_kernel(%arg0: i32, %arg1: memref<1x8x32xf32, #tpu.memory_space<vmem>>, %arg2: memref<1x1x8xf32, #tpu.memory_space<vmem>>, %arg3: memref<1x32xf32, #tpu.memory_space<vmem>>, %arg4: memref<1x32xf32, #tpu.memory_space<vmem>>, %arg5: memref<32x96xbf16, #tpu.memory_space<vmem>>, %arg6: memref<1x96xf32, #tpu.memory_space<vmem>>, %arg7: memref<32x32xbf16, #tpu.memory_space<vmem>>, %arg8: memref<1x32xf32, #tpu.memory_space<vmem>>, %arg9: memref<1x32xf32, #tpu.memory_space<vmem>>, %arg10: memref<1x32xf32, #tpu.memory_space<vmem>>, %arg11: memref<32x64xbf16, #tpu.memory_space<vmem>>, %arg12: memref<1x64xf32, #tpu.memory_space<vmem>>, %arg13: memref<64x32xbf16, #tpu.memory_space<vmem>>, %arg14: memref<1x32xf32, #tpu.memory_space<vmem>>, %arg15: memref<1x8x32xf32, #tpu.memory_space<vmem>>, %arg16: memref<8x32xbf16, #tpu.memory_space<vmem>>) attributes {dimension_semantics = [#tpu.dimension_semantics<parallel>], iteration_bounds = array<i64: 2>, scalar_prefetch = 0 : i64, scratch_operands = 1 : i64, tpu.core_type = #tpu.core_type<tc>, window_params = [{transform_indices = @transform_0, window_bounds = array<i64: 1, 8, 32>}, {transform_indices = @transform_1, window_bounds = array<i64: 1, 1, 8>}, {pipeline_mode = #tpu.pipeline_mode<synchronous>, transform_indices = @transform_2, window_bounds = array<i64: 1, 32>}, {pipeline_mode = #tpu.pipeline_mode<synchronous>, transform_indices = @transform_3, window_bounds = array<i64: 1, 32>}, {pipeline_mode = #tpu.pipeline_mode<synchronous>, transform_indices = @transform_4, window_bounds = array<i64: 32, 96>}, {pipeline_mode = #tpu.pipeline_mode<synchronous>, transform_indices = @transform_5, window_bounds = array<i64: 1, 96>}, {pipeline_mode = #tpu.pipeline_mode<synchronous>, transform_indices = @transform_6, window_bounds = array<i64: 32, 32>}, {pipeline_mode = #tpu.pipeline_mode<synchronous>, transform_indices = @transform_7, window_bounds = array<i64: 1, 32>}, {pipeline_mode = #tpu.pipeline_mode<synchronous>, transform_indices = @transform_8, window_bounds = array<i64: 1, 32>}, {pipeline_mode = #tpu.pipeline_mode<synchronous>, transform_indices = @transform_9, window_bounds = array<i64: 1, 32>}, {pipeline_mode = #tpu.pipeline_mode<synchronous>, transform_indices = @transform_10, window_bounds = array<i64: 32, 64>}, {pipeline_mode = #tpu.pipeline_mode<synchronous>, transform_indices = @transform_11, window_bounds = array<i64: 1, 64>}, {pipeline_mode = #tpu.pipeline_mode<synchronous>, transform_indices = @transform_12, window_bounds = array<i64: 64, 32>}, {pipeline_mode = #tpu.pipeline_mode<synchronous>, transform_indices = @transform_13, window_bounds = array<i64: 1, 32>}, {transform_indices = @transform_14, window_bounds = array<i64: 1, 8, 32>}]} {
    %c0 = arith.constant 0 : index
    %c0_0 = arith.constant 0 : index
    %c0_1 = arith.constant 0 : index
    %0 = vector.load %arg1[%c0, %c0_0, %c0_1] : memref<1x8x32xf32, #tpu.memory_space<vmem>>, vector<1x8x32xf32>
    %1 = vector.shape_cast %0 : vector<1x8x32xf32> to vector<8x32xf32>
    %c0_2 = arith.constant 0 : index
    %c0_3 = arith.constant 0 : index
    %c0_4 = arith.constant 0 : index
    %2 = vector.load %arg2[%c0_2, %c0_3, %c0_4] : memref<1x1x8xf32, #tpu.memory_space<vmem>>, vector<1x1x8xf32>
    %cst = arith.constant 0.000000e+00 : f32
    %3 = vector.broadcast %cst : f32 to vector<1x1x8xf32>
    %4 = arith.cmpf ogt, %2, %3 : vector<1x1x8xf32>
    %cst_5 = arith.constant 0.000000e+00 : f32
    %cst_6 = arith.constant -1.000000e+09 : f32
    %5 = vector.broadcast %cst_5 : f32 to vector<1x1x8xf32>
    %6 = vector.broadcast %cst_6 : f32 to vector<1x1x8xf32>
    %7 = arith.select %4, %5, %6 : vector<1x1x8xi1>, vector<1x1x8xf32>
    %c0_7 = arith.constant 0 : index
    %c0_8 = arith.constant 0 : index
    %8 = vector.load %arg3[%c0_7, %c0_8] : memref<1x32xf32, #tpu.memory_space<vmem>>, vector<1x32xf32>
    %c0_9 = arith.constant 0 : index
    %c0_10 = arith.constant 0 : index
    %9 = vector.load %arg4[%c0_9, %c0_10] : memref<1x32xf32, #tpu.memory_space<vmem>>, vector<1x32xf32>
    %cst_11 = arith.constant dense<0.000000e+00> : vector<8xf32>
    %10 = vector.multi_reduction <add>, %1, %cst_11 [1] : vector<8x32xf32> to vector<8xf32>
    %11 = vector.shape_cast %10 : vector<8xf32> to vector<8x1xf32>
    %cst_12 = arith.constant 3.200000e+01 : f32
    %12 = vector.broadcast %cst_12 : f32 to vector<8x1xf32>
    %13 = arith.divf %11, %12 : vector<8x1xf32>
    %14 = vector.broadcast %13 : vector<8x1xf32> to vector<8x32xf32>
    %15 = arith.subf %1, %14 : vector<8x32xf32>
    %16 = arith.mulf %15, %15 : vector<8x32xf32>
    %cst_13 = arith.constant dense<0.000000e+00> : vector<8xf32>
    %17 = vector.multi_reduction <add>, %16, %cst_13 [1] : vector<8x32xf32> to vector<8xf32>
    %18 = vector.shape_cast %17 : vector<8xf32> to vector<8x1xf32>
    %cst_14 = arith.constant 0.0322580636 : f32
    %19 = vector.broadcast %cst_14 : f32 to vector<8x1xf32>
    %20 = arith.mulf %18, %19 : vector<8x1xf32>
    %21 = math.sqrt %20 : vector<8x1xf32>
    %cst_15 = arith.constant 9.99999997E-7 : f32
    %22 = vector.broadcast %cst_15 : f32 to vector<8x1xf32>
    %23 = arith.addf %21, %22 : vector<8x1xf32>
    %24 = tpu.reciprocal %23 {approx = true} : vector<8x1xf32> -> vector<8x1xf32>
    %25 = vector.broadcast %24 : vector<8x1xf32> to vector<8x32xf32>
    %26 = arith.mulf %15, %25 : vector<8x32xf32>
    %27 = vector.broadcast %8 : vector<1x32xf32> to vector<8x32xf32>
    %28 = arith.mulf %27, %26 : vector<8x32xf32>
    %29 = vector.broadcast %9 : vector<1x32xf32> to vector<8x32xf32>
    %30 = arith.addf %28, %29 : vector<8x32xf32>
    %31 = arith.truncf %30 : vector<8x32xf32> to vector<8x32xbf16>
    %c0_16 = arith.constant 0 : index
    %c0_17 = arith.constant 0 : index
    %32 = vector.load %arg5[%c0_16, %c0_17] : memref<32x96xbf16, #tpu.memory_space<vmem>>, vector<32x96xbf16>
    %cst_18 = arith.constant dense<0.000000e+00> : vector<8x96xf32>
    %33 = tpu.matmul %31, %32, %cst_18 {dimension_numbers = #tpu.dot_dimension_numbers<[1], [0], [0], [1], [0, 0, 1, 1], [], []>} : vector<8x32xbf16>, vector<32x96xbf16>, vector<8x96xf32> -> vector<8x96xf32>
    %c0_19 = arith.constant 0 : index
    %c0_20 = arith.constant 0 : index
    %34 = vector.load %arg6[%c0_19, %c0_20] : memref<1x96xf32, #tpu.memory_space<vmem>>, vector<1x96xf32>
    %35 = vector.broadcast %34 : vector<1x96xf32> to vector<8x96xf32>
    %36 = arith.addf %33, %35 : vector<8x96xf32>
    %37 = arith.truncf %36 : vector<8x96xf32> to vector<8x96xbf16>
    %38 = vector.extract_strided_slice %37 {offsets = [0, 0], sizes = [8, 8], strides = [1, 1]} : vector<8x96xbf16> to vector<8x8xbf16>
    %39 = vector.shape_cast %38 : vector<8x8xbf16> to vector<1x8x8xbf16>
    %40 = vector.extract_strided_slice %37 {offsets = [0, 32], sizes = [8, 8], strides = [1, 1]} : vector<8x96xbf16> to vector<8x8xbf16>
    %41 = vector.shape_cast %40 : vector<8x8xbf16> to vector<1x8x8xbf16>
    %42 = vector.extract_strided_slice %37 {offsets = [0, 64], sizes = [8, 8], strides = [1, 1]} : vector<8x96xbf16> to vector<8x8xbf16>
    %43 = vector.shape_cast %42 : vector<8x8xbf16> to vector<1x8x8xbf16>
    "tpu.trace_start"() <{level = 10 : i32, message = "bqd,bkd->bqk"}> : () -> ()
    %cst_21 = arith.constant dense<0.000000e+00> : vector<1x8x8xf32>
    %44 = tpu.matmul %39, %41, %cst_21 {dimension_numbers = #tpu.dot_dimension_numbers<[2], [2], [1], [1], [0, 0, 0, 1, 1, 1], [0], [0]>} : vector<1x8x8xbf16>, vector<1x8x8xbf16>, vector<1x8x8xf32> -> vector<1x8x8xf32>
    "tpu.trace_stop"() : () -> ()
    %45 = vector.broadcast %7 : vector<1x1x8xf32> to vector<1x8x8xf32>
    %46 = arith.addf %44, %45 : vector<1x8x8xf32>
    %cst_22 = arith.constant dense<0xFF800000> : vector<1x8xf32>
    %47 = vector.multi_reduction <maximumf>, %46, %cst_22 [2] : vector<1x8x8xf32> to vector<1x8xf32>
    %48 = vector.shape_cast %47 : vector<1x8xf32> to vector<1x8x1xf32>
    %49 = vector.broadcast %48 : vector<1x8x1xf32> to vector<1x8x8xf32>
    %50 = arith.subf %46, %49 : vector<1x8x8xf32>
    %51 = math.exp %50 : vector<1x8x8xf32>
    %cst_23 = arith.constant dense<0.000000e+00> : vector<1x8xf32>
    %52 = vector.multi_reduction <add>, %51, %cst_23 [2] : vector<1x8x8xf32> to vector<1x8xf32>
    %53 = vector.shape_cast %52 : vector<1x8xf32> to vector<1x8x1xf32>
    %54 = arith.truncf %51 : vector<1x8x8xf32> to vector<1x8x8xbf16>
    "tpu.trace_start"() <{level = 10 : i32, message = "bqk,bkd->bqd"}> : () -> ()
    %cst_24 = arith.constant dense<0.000000e+00> : vector<1x8x8xf32>
    %55 = tpu.matmul %54, %43, %cst_24 {dimension_numbers = #tpu.dot_dimension_numbers<[2], [1], [1], [2], [0, 0, 0, 1, 1, 2], [0], [0]>} : vector<1x8x8xbf16>, vector<1x8x8xbf16>, vector<1x8x8xf32> -> vector<1x8x8xf32>
    "tpu.trace_stop"() : () -> ()
    %56 = tpu.reciprocal %53 {approx = true} : vector<1x8x1xf32> -> vector<1x8x1xf32>
    %57 = vector.broadcast %56 : vector<1x8x1xf32> to vector<1x8x8xf32>
    %58 = arith.mulf %55, %57 : vector<1x8x8xf32>
    %59 = vector.shape_cast %58 : vector<1x8x8xf32> to vector<8x8xf32>
    %60 = arith.truncf %59 : vector<8x8xf32> to vector<8x8xbf16>
    %c0_25 = arith.constant 0 : index
    %c0_26 = arith.constant 0 : index
    %61 = vector.load %arg16[%c0_25, %c0_26] : memref<8x32xbf16, #tpu.memory_space<vmem>>, vector<8x8xbf16>
    tpu.vector_store %arg16[%c0_25, %c0_26], %60 {strides = array<i32>} : memref<8x32xbf16, #tpu.memory_space<vmem>>, vector<8x8xbf16>,
    %62 = vector.extract_strided_slice %37 {offsets = [0, 8], sizes = [8, 8], strides = [1, 1]} : vector<8x96xbf16> to vector<8x8xbf16>
    %63 = vector.shape_cast %62 : vector<8x8xbf16> to vector<1x8x8xbf16>
    %64 = vector.extract_strided_slice %37 {offsets = [0, 40], sizes = [8, 8], strides = [1, 1]} : vector<8x96xbf16> to vector<8x8xbf16>
    %65 = vector.shape_cast %64 : vector<8x8xbf16> to vector<1x8x8xbf16>
    %66 = vector.extract_strided_slice %37 {offsets = [0, 72], sizes = [8, 8], strides = [1, 1]} : vector<8x96xbf16> to vector<8x8xbf16>
    %67 = vector.shape_cast %66 : vector<8x8xbf16> to vector<1x8x8xbf16>
    "tpu.trace_start"() <{level = 10 : i32, message = "bqd,bkd->bqk"}> : () -> ()
    %cst_27 = arith.constant dense<0.000000e+00> : vector<1x8x8xf32>
    %68 = tpu.matmul %63, %65, %cst_27 {dimension_numbers = #tpu.dot_dimension_numbers<[2], [2], [1], [1], [0, 0, 0, 1, 1, 1], [0], [0]>} : vector<1x8x8xbf16>, vector<1x8x8xbf16>, vector<1x8x8xf32> -> vector<1x8x8xf32>
    "tpu.trace_stop"() : () -> ()
    %69 = vector.broadcast %7 : vector<1x1x8xf32> to vector<1x8x8xf32>
    %70 = arith.addf %68, %69 : vector<1x8x8xf32>
    %cst_28 = arith.constant dense<0xFF800000> : vector<1x8xf32>
    %71 = vector.multi_reduction <maximumf>, %70, %cst_28 [2] : vector<1x8x8xf32> to vector<1x8xf32>
    %72 = vector.shape_cast %71 : vector<1x8xf32> to vector<1x8x1xf32>
    %73 = vector.broadcast %72 : vector<1x8x1xf32> to vector<1x8x8xf32>
    %74 = arith.subf %70, %73 : vector<1x8x8xf32>
    %75 = math.exp %74 : vector<1x8x8xf32>
    %cst_29 = arith.constant dense<0.000000e+00> : vector<1x8xf32>
    %76 = vector.multi_reduction <add>, %75, %cst_29 [2] : vector<1x8x8xf32> to vector<1x8xf32>
    %77 = vector.shape_cast %76 : vector<1x8xf32> to vector<1x8x1xf32>
    %78 = arith.truncf %75 : vector<1x8x8xf32> to vector<1x8x8xbf16>
    "tpu.trace_start"() <{level = 10 : i32, message = "bqk,bkd->bqd"}> : () -> ()
    %cst_30 = arith.constant dense<0.000000e+00> : vector<1x8x8xf32>
    %79 = tpu.matmul %78, %67, %cst_30 {dimension_numbers = #tpu.dot_dimension_numbers<[2], [1], [1], [2], [0, 0, 0, 1, 1, 2], [0], [0]>} : vector<1x8x8xbf16>, vector<1x8x8xbf16>, vector<1x8x8xf32> -> vector<1x8x8xf32>
    "tpu.trace_stop"() : () -> ()
    %80 = tpu.reciprocal %77 {approx = true} : vector<1x8x1xf32> -> vector<1x8x1xf32>
    %81 = vector.broadcast %80 : vector<1x8x1xf32> to vector<1x8x8xf32>
    %82 = arith.mulf %79, %81 : vector<1x8x8xf32>
    %83 = vector.shape_cast %82 : vector<1x8x8xf32> to vector<8x8xf32>
    %84 = arith.truncf %83 : vector<8x8xf32> to vector<8x8xbf16>
    %c0_31 = arith.constant 0 : index
    %c8 = arith.constant 8 : index
    %85 = vector.load %arg16[%c0_31, %c8] : memref<8x32xbf16, #tpu.memory_space<vmem>>, vector<8x8xbf16>
    tpu.vector_store %arg16[%c0_31, %c8], %84 {strides = array<i32>} : memref<8x32xbf16, #tpu.memory_space<vmem>>, vector<8x8xbf16>,
    %86 = vector.extract_strided_slice %37 {offsets = [0, 16], sizes = [8, 8], strides = [1, 1]} : vector<8x96xbf16> to vector<8x8xbf16>
    %87 = vector.shape_cast %86 : vector<8x8xbf16> to vector<1x8x8xbf16>
    %88 = vector.extract_strided_slice %37 {offsets = [0, 48], sizes = [8, 8], strides = [1, 1]} : vector<8x96xbf16> to vector<8x8xbf16>
    %89 = vector.shape_cast %88 : vector<8x8xbf16> to vector<1x8x8xbf16>
    %90 = vector.extract_strided_slice %37 {offsets = [0, 80], sizes = [8, 8], strides = [1, 1]} : vector<8x96xbf16> to vector<8x8xbf16>
    %91 = vector.shape_cast %90 : vector<8x8xbf16> to vector<1x8x8xbf16>
    "tpu.trace_start"() <{level = 10 : i32, message = "bqd,bkd->bqk"}> : () -> ()
    %cst_32 = arith.constant dense<0.000000e+00> : vector<1x8x8xf32>
    %92 = tpu.matmul %87, %89, %cst_32 {dimension_numbers = #tpu.dot_dimension_numbers<[2], [2], [1], [1], [0, 0, 0, 1, 1, 1], [0], [0]>} : vector<1x8x8xbf16>, vector<1x8x8xbf16>, vector<1x8x8xf32> -> vector<1x8x8xf32>
    "tpu.trace_stop"() : () -> ()
    %93 = vector.broadcast %7 : vector<1x1x8xf32> to vector<1x8x8xf32>
    %94 = arith.addf %92, %93 : vector<1x8x8xf32>
    %cst_33 = arith.constant dense<0xFF800000> : vector<1x8xf32>
    %95 = vector.multi_reduction <maximumf>, %94, %cst_33 [2] : vector<1x8x8xf32> to vector<1x8xf32>
    %96 = vector.shape_cast %95 : vector<1x8xf32> to vector<1x8x1xf32>
    %97 = vector.broadcast %96 : vector<1x8x1xf32> to vector<1x8x8xf32>
    %98 = arith.subf %94, %97 : vector<1x8x8xf32>
    %99 = math.exp %98 : vector<1x8x8xf32>
    %cst_34 = arith.constant dense<0.000000e+00> : vector<1x8xf32>
    %100 = vector.multi_reduction <add>, %99, %cst_34 [2] : vector<1x8x8xf32> to vector<1x8xf32>
    %101 = vector.shape_cast %100 : vector<1x8xf32> to vector<1x8x1xf32>
    %102 = arith.truncf %99 : vector<1x8x8xf32> to vector<1x8x8xbf16>
    "tpu.trace_start"() <{level = 10 : i32, message = "bqk,bkd->bqd"}> : () -> ()
    %cst_35 = arith.constant dense<0.000000e+00> : vector<1x8x8xf32>
    %103 = tpu.matmul %102, %91, %cst_35 {dimension_numbers = #tpu.dot_dimension_numbers<[2], [1], [1], [2], [0, 0, 0, 1, 1, 2], [0], [0]>} : vector<1x8x8xbf16>, vector<1x8x8xbf16>, vector<1x8x8xf32> -> vector<1x8x8xf32>
    "tpu.trace_stop"() : () -> ()
    %104 = tpu.reciprocal %101 {approx = true} : vector<1x8x1xf32> -> vector<1x8x1xf32>
    %105 = vector.broadcast %104 : vector<1x8x1xf32> to vector<1x8x8xf32>
    %106 = arith.mulf %103, %105 : vector<1x8x8xf32>
    %107 = vector.shape_cast %106 : vector<1x8x8xf32> to vector<8x8xf32>
    %108 = arith.truncf %107 : vector<8x8xf32> to vector<8x8xbf16>
    %c0_36 = arith.constant 0 : index
    %c16 = arith.constant 16 : index
    %109 = vector.load %arg16[%c0_36, %c16] : memref<8x32xbf16, #tpu.memory_space<vmem>>, vector<8x8xbf16>
    tpu.vector_store %arg16[%c0_36, %c16], %108 {strides = array<i32>} : memref<8x32xbf16, #tpu.memory_space<vmem>>, vector<8x8xbf16>,
    %110 = vector.extract_strided_slice %37 {offsets = [0, 24], sizes = [8, 8], strides = [1, 1]} : vector<8x96xbf16> to vector<8x8xbf16>
    %111 = vector.shape_cast %110 : vector<8x8xbf16> to vector<1x8x8xbf16>
    %112 = vector.extract_strided_slice %37 {offsets = [0, 56], sizes = [8, 8], strides = [1, 1]} : vector<8x96xbf16> to vector<8x8xbf16>
    %113 = vector.shape_cast %112 : vector<8x8xbf16> to vector<1x8x8xbf16>
    %114 = vector.extract_strided_slice %37 {offsets = [0, 88], sizes = [8, 8], strides = [1, 1]} : vector<8x96xbf16> to vector<8x8xbf16>
    %115 = vector.shape_cast %114 : vector<8x8xbf16> to vector<1x8x8xbf16>
    "tpu.trace_start"() <{level = 10 : i32, message = "bqd,bkd->bqk"}> : () -> ()
    %cst_37 = arith.constant dense<0.000000e+00> : vector<1x8x8xf32>
    %116 = tpu.matmul %111, %113, %cst_37 {dimension_numbers = #tpu.dot_dimension_numbers<[2], [2], [1], [1], [0, 0, 0, 1, 1, 1], [0], [0]>} : vector<1x8x8xbf16>, vector<1x8x8xbf16>, vector<1x8x8xf32> -> vector<1x8x8xf32>
    "tpu.trace_stop"() : () -> ()
    %117 = vector.broadcast %7 : vector<1x1x8xf32> to vector<1x8x8xf32>
    %118 = arith.addf %116, %117 : vector<1x8x8xf32>
    %cst_38 = arith.constant dense<0xFF800000> : vector<1x8xf32>
    %119 = vector.multi_reduction <maximumf>, %118, %cst_38 [2] : vector<1x8x8xf32> to vector<1x8xf32>
    %120 = vector.shape_cast %119 : vector<1x8xf32> to vector<1x8x1xf32>
    %121 = vector.broadcast %120 : vector<1x8x1xf32> to vector<1x8x8xf32>
    %122 = arith.subf %118, %121 : vector<1x8x8xf32>
    %123 = math.exp %122 : vector<1x8x8xf32>
    %cst_39 = arith.constant dense<0.000000e+00> : vector<1x8xf32>
    %124 = vector.multi_reduction <add>, %123, %cst_39 [2] : vector<1x8x8xf32> to vector<1x8xf32>
    %125 = vector.shape_cast %124 : vector<1x8xf32> to vector<1x8x1xf32>
    %126 = arith.truncf %123 : vector<1x8x8xf32> to vector<1x8x8xbf16>
    "tpu.trace_start"() <{level = 10 : i32, message = "bqk,bkd->bqd"}> : () -> ()
    %cst_40 = arith.constant dense<0.000000e+00> : vector<1x8x8xf32>
    %127 = tpu.matmul %126, %115, %cst_40 {dimension_numbers = #tpu.dot_dimension_numbers<[2], [1], [1], [2], [0, 0, 0, 1, 1, 2], [0], [0]>} : vector<1x8x8xbf16>, vector<1x8x8xbf16>, vector<1x8x8xf32> -> vector<1x8x8xf32>
    "tpu.trace_stop"() : () -> ()
    %128 = tpu.reciprocal %125 {approx = true} : vector<1x8x1xf32> -> vector<1x8x1xf32>
    %129 = vector.broadcast %128 : vector<1x8x1xf32> to vector<1x8x8xf32>
    %130 = arith.mulf %127, %129 : vector<1x8x8xf32>
    %131 = vector.shape_cast %130 : vector<1x8x8xf32> to vector<8x8xf32>
    %132 = arith.truncf %131 : vector<8x8xf32> to vector<8x8xbf16>
    %c0_41 = arith.constant 0 : index
    %c24 = arith.constant 24 : index
    %133 = vector.load %arg16[%c0_41, %c24] : memref<8x32xbf16, #tpu.memory_space<vmem>>, vector<8x8xbf16>
    tpu.vector_store %arg16[%c0_41, %c24], %132 {strides = array<i32>} : memref<8x32xbf16, #tpu.memory_space<vmem>>, vector<8x8xbf16>,
    %c0_42 = arith.constant 0 : index
    %c0_43 = arith.constant 0 : index
    %134 = vector.load %arg16[%c0_42, %c0_43] : memref<8x32xbf16, #tpu.memory_space<vmem>>, vector<8x32xbf16>
    %c0_44 = arith.constant 0 : index
    %c0_45 = arith.constant 0 : index
    %135 = vector.load %arg7[%c0_44, %c0_45] : memref<32x32xbf16, #tpu.memory_space<vmem>>, vector<32x32xbf16>
    %cst_46 = arith.constant dense<0.000000e+00> : vector<8x32xf32>
    %136 = tpu.matmul %134, %135, %cst_46 {dimension_numbers = #tpu.dot_dimension_numbers<[1], [0], [0], [1], [0, 0, 1, 1], [], []>} : vector<8x32xbf16>, vector<32x32xbf16>, vector<8x32xf32> -> vector<8x32xf32>
    %c0_47 = arith.constant 0 : index
    %c0_48 = arith.constant 0 : index
    %137 = vector.load %arg8[%c0_47, %c0_48] : memref<1x32xf32, #tpu.memory_space<vmem>>, vector<1x32xf32>
    %138 = vector.broadcast %137 : vector<1x32xf32> to vector<8x32xf32>
    %139 = arith.addf %136, %138 : vector<8x32xf32>
    %140 = arith.addf %1, %139 : vector<8x32xf32>
    %c0_49 = arith.constant 0 : index
    %c0_50 = arith.constant 0 : index
    %141 = vector.load %arg9[%c0_49, %c0_50] : memref<1x32xf32, #tpu.memory_space<vmem>>, vector<1x32xf32>
    %c0_51 = arith.constant 0 : index
    %c0_52 = arith.constant 0 : index
    %142 = vector.load %arg10[%c0_51, %c0_52] : memref<1x32xf32, #tpu.memory_space<vmem>>, vector<1x32xf32>
    %cst_53 = arith.constant dense<0.000000e+00> : vector<8xf32>
    %143 = vector.multi_reduction <add>, %140, %cst_53 [1] : vector<8x32xf32> to vector<8xf32>
    %144 = vector.shape_cast %143 : vector<8xf32> to vector<8x1xf32>
    %cst_54 = arith.constant 3.200000e+01 : f32
    %145 = vector.broadcast %cst_54 : f32 to vector<8x1xf32>
    %146 = arith.divf %144, %145 : vector<8x1xf32>
    %147 = vector.broadcast %146 : vector<8x1xf32> to vector<8x32xf32>
    %148 = arith.subf %140, %147 : vector<8x32xf32>
    %149 = arith.mulf %148, %148 : vector<8x32xf32>
    %cst_55 = arith.constant dense<0.000000e+00> : vector<8xf32>
    %150 = vector.multi_reduction <add>, %149, %cst_55 [1] : vector<8x32xf32> to vector<8xf32>
    %151 = vector.shape_cast %150 : vector<8xf32> to vector<8x1xf32>
    %cst_56 = arith.constant 0.0322580636 : f32
    %152 = vector.broadcast %cst_56 : f32 to vector<8x1xf32>
    %153 = arith.mulf %151, %152 : vector<8x1xf32>
    %154 = math.sqrt %153 : vector<8x1xf32>
    %cst_57 = arith.constant 9.99999997E-7 : f32
    %155 = vector.broadcast %cst_57 : f32 to vector<8x1xf32>
    %156 = arith.addf %154, %155 : vector<8x1xf32>
    %157 = tpu.reciprocal %156 {approx = true} : vector<8x1xf32> -> vector<8x1xf32>
    %158 = vector.broadcast %157 : vector<8x1xf32> to vector<8x32xf32>
    %159 = arith.mulf %148, %158 : vector<8x32xf32>
    %160 = vector.broadcast %141 : vector<1x32xf32> to vector<8x32xf32>
    %161 = arith.mulf %160, %159 : vector<8x32xf32>
    %162 = vector.broadcast %142 : vector<1x32xf32> to vector<8x32xf32>
    %163 = arith.addf %161, %162 : vector<8x32xf32>
    %164 = arith.truncf %163 : vector<8x32xf32> to vector<8x32xbf16>
    %c0_58 = arith.constant 0 : index
    %c0_59 = arith.constant 0 : index
    %165 = vector.load %arg11[%c0_58, %c0_59] : memref<32x64xbf16, #tpu.memory_space<vmem>>, vector<32x64xbf16>
    %cst_60 = arith.constant dense<0.000000e+00> : vector<8x64xf32>
    %166 = tpu.matmul %164, %165, %cst_60 {dimension_numbers = #tpu.dot_dimension_numbers<[1], [0], [0], [1], [0, 0, 1, 1], [], []>} : vector<8x32xbf16>, vector<32x64xbf16>, vector<8x64xf32> -> vector<8x64xf32>
    %c0_61 = arith.constant 0 : index
    %c0_62 = arith.constant 0 : index
    %167 = vector.load %arg12[%c0_61, %c0_62] : memref<1x64xf32, #tpu.memory_space<vmem>>, vector<1x64xf32>
    %168 = vector.broadcast %167 : vector<1x64xf32> to vector<8x64xf32>
    %169 = arith.addf %166, %168 : vector<8x64xf32>
    %cst_63 = arith.constant 0.000000e+00 : f32
    %170 = vector.broadcast %cst_63 : f32 to vector<8x64xf32>
    %171 = arith.maximumf %169, %170 : vector<8x64xf32>
    %172 = arith.truncf %171 : vector<8x64xf32> to vector<8x64xbf16>
    %c0_64 = arith.constant 0 : index
    %c0_65 = arith.constant 0 : index
    %173 = vector.load %arg13[%c0_64, %c0_65] : memref<64x32xbf16, #tpu.memory_space<vmem>>, vector<64x32xbf16>
    %cst_66 = arith.constant dense<0.000000e+00> : vector<8x32xf32>
    %174 = tpu.matmul %172, %173, %cst_66 {dimension_numbers = #tpu.dot_dimension_numbers<[1], [0], [0], [1], [0, 0, 1, 1], [], []>} : vector<8x64xbf16>, vector<64x32xbf16>, vector<8x32xf32> -> vector<8x32xf32>
    %c0_67 = arith.constant 0 : index
    %c0_68 = arith.constant 0 : index
    %175 = vector.load %arg14[%c0_67, %c0_68] : memref<1x32xf32, #tpu.memory_space<vmem>>, vector<1x32xf32>
    %176 = vector.broadcast %175 : vector<1x32xf32> to vector<8x32xf32>
    %177 = arith.addf %174, %176 : vector<8x32xf32>
    %178 = arith.addf %140, %177 : vector<8x32xf32>
    %179 = vector.shape_cast %178 : vector<8x32xf32> to vector<1x8x32xf32>
    %c0_69 = arith.constant 0 : index
    %c0_70 = arith.constant 0 : index
    %c0_71 = arith.constant 0 : index
    %180 = vector.load %arg15[%c0_69, %c0_70, %c0_71] : memref<1x8x32xf32, #tpu.memory_space<vmem>>, vector<1x8x32xf32>
    tpu.vector_store %arg15[%c0_69, %c0_70, %c0_71], %179 {strides = array<i32>} : memref<1x8x32xf32, #tpu.memory_space<vmem>>, vector<1x8x32xf32>,
    return
  }
  func.func @transform_0(%arg0: i32) -> (i32, i32, i32) {
    %c0_i32 = arith.constant 0 : i32
    %c0_i32_0 = arith.constant 0 : i32
    %c0_i32_1 = arith.constant 0 : i32
    return %arg0, %c0_i32, %c0_i32_0 : i32, i32, i32
  }
  func.func @transform_1(%arg0: i32) -> (i32, i32, i32) {
    %c0_i32 = arith.constant 0 : i32
    %c0_i32_0 = arith.constant 0 : i32
    %c0_i32_1 = arith.constant 0 : i32
    return %arg0, %c0_i32, %c0_i32_0 : i32, i32, i32
  }
  func.func @transform_2(%arg0: i32) -> (i32, i32) {
    %c0_i32 = arith.constant 0 : i32
    %c0_i32_0 = arith.constant 0 : i32
    %c0_i32_1 = arith.constant 0 : i32
    return %c0_i32, %c0_i32_0 : i32, i32
  }
  func.func @transform_3(%arg0: i32) -> (i32, i32) {
    %c0_i32 = arith.constant 0 : i32
    %c0_i32_0 = arith.constant 0 : i32
    %c0_i32_1 = arith.constant 0 : i32
    return %c0_i32, %c0_i32_0 : i32, i32
  }
  func.func @transform_4(%arg0: i32) -> (i32, i32) {
    %c0_i32 = arith.constant 0 : i32
    %c0_i32_0 = arith.constant 0 : i32
    %c0_i32_1 = arith.constant 0 : i32
    return %c0_i32, %c0_i32_0 : i32, i32
  }
  func.func @transform_5(%arg0: i32) -> (i32, i32) {
    %c0_i32 = arith.constant 0 : i32
    %c0_i32_0 = arith.constant 0 : i32
    %c0_i32_1 = arith.constant 0 : i32
    return %c0_i32, %c0_i32_0 : i32, i32
  }
  func.func @transform_6(%arg0: i32) -> (i32, i32) {
    %c0_i32 = arith.constant 0 : i32
    %c0_i32_0 = arith.constant 0 : i32
    %c0_i32_1 = arith.constant 0 : i32
    return %c0_i32, %c0_i32_0 : i32, i32
  }
  func.func @transform_7(%arg0: i32) -> (i32, i32) {
    %c0_i32 = arith.constant 0 : i32
    %c0_i32_0 = arith.constant 0 : i32
    %c0_i32_1 = arith.constant 0 : i32
    return %c0_i32, %c0_i32_0 : i32, i32
  }
  func.func @transform_8(%arg0: i32) -> (i32, i32) {
    %c0_i32 = arith.constant 0 : i32
    %c0_i32_0 = arith.constant 0 : i32
    %c0_i32_1 = arith.constant 0 : i32
    return %c0_i32, %c0_i32_0 : i32, i32
  }
  func.func @transform_9(%arg0: i32) -> (i32, i32) {
    %c0_i32 = arith.constant 0 : i32
    %c0_i32_0 = arith.constant 0 : i32
    %c0_i32_1 = arith.constant 0 : i32
    return %c0_i32, %c0_i32_0 : i32, i32
  }
  func.func @transform_10(%arg0: i32) -> (i32, i32) {
    %c0_i32 = arith.constant 0 : i32
    %c0_i32_0 = arith.constant 0 : i32
    %c0_i32_1 = arith.constant 0 : i32
    return %c0_i32, %c0_i32_0 : i32, i32
  }
  func.func @transform_11(%arg0: i32) -> (i32, i32) {
    %c0_i32 = arith.constant 0 : i32
    %c0_i32_0 = arith.constant 0 : i32
    %c0_i32_1 = arith.constant 0 : i32
    return %c0_i32, %c0_i32_0 : i32, i32
  }
  func.func @transform_12(%arg0: i32) -> (i32, i32) {
    %c0_i32 = arith.constant 0 : i32
    %c0_i32_0 = arith.constant 0 : i32
    %c0_i32_1 = arith.constant 0 : i32
    return %c0_i32, %c0_i32_0 : i32, i32
  }
  func.func @transform_13(%arg0: i32) -> (i32, i32) {
    %c0_i32 = arith.constant 0 : i32
    %c0_i32_0 = arith.constant 0 : i32
    %c0_i32_1 = arith.constant 0 : i32
    return %c0_i32, %c0_i32_0 : i32, i32
  }
  func.func @transform_14(%arg0: i32) -> (i32, i32, i32) {
    %c0_i32 = arith.constant 0 : i32
    %c0_i32_0 = arith.constant 0 : i32
    %c0_i32_1 = arith.constant 0 : i32
    return %arg0, %c0_i32, %c0_i32_0 : i32, i32, i32
  }
}

</mosaic_0001>

<bundles_post_ra>
// kernel: tpu_custom_call.1
= control target key start
LH: loop header
LB: loop body
LE: loop exit
PB: predicated region body
PF: predicated region fallthrough
CT: control target
= control target key end

     0   :  { %s2613_s0 = inlined_call_operand.vmem [shape: f32[2,8,32], index: 0, kind: input, shape index: {}]   ;;  %s2614_s1 = inlined_call_operand.vmem [shape: f32[2,1,8], index: 1, kind: input, shape index: {}]   ;;  %s2615_s2 = inlined_call_operand.hbm [shape: f32[1,32], index: 2, kind: input, shape index: {}]   ;;  %s2616_s3 = inlined_call_operand.hbm [shape: f32[1,32], index: 3, kind: input, shape index: {}]   ;;  %s2617_s4 = inlined_call_operand.vmem [shape: bf16[32,96], index: 4, kind: input, shape index: {}]   ;;  %s2618_s5 = inlined_call_operand.hbm [shape: f32[1,96], index: 5, kind: input, shape index: {}]   ;;  %s2619_s6 = inlined_call_operand.vmem [shape: bf16[32,32], index: 6, kind: input, shape index: {}]   ;;  %s2620_s7 = inlined_call_operand.hbm [shape: f32[1,32], index: 7, kind: input, shape index: {}]   ;;  %s2621_s8 = inlined_call_operand.hbm [shape: f32[1,32], index: 8, kind: input, shape index: {}]   ;;  %s2622_s9 = inlined_call_operand.hbm [shape: f32[1,32], index: 9, kind: input, shape index: {}]   ;;  %s2623_s10 = inlined_call_operand.vmem [shape: bf16[32,64], index: 10, kind: input, shape index: {}]   ;;  %s2624_s11 = inlined_call_operand.vmem [shape: f32[1,64], index: 11, kind: input, shape index: {}]   ;;  %s2625_s12 = inlined_call_operand.vmem [shape: bf16[64,32], index: 12, kind: input, shape index: {}]   ;;  %s2626_s13 = inlined_call_operand.vmem [shape: f32[1,32], index: 13, kind: input, shape index: {}]   ;;  %s2627_s14 = inlined_call_operand.hbm [shape: f32[2,8,32], index: 14, kind: output, shape index: {}]  }
   0x1   :  { %2640 = sst [smem:[#allocation27_spill]] %s2616_s3 }
   0x2   :  { %2641 = sst [smem:[#allocation28_spill]] %s2627_s14 }
   0x3   :  { %19 = vsyncpa [#allocation4], 0 }
   0x4   :  { %20 = vsyncpa [#allocation7], 0 }
   0x5   :  { %21 = vsyncpa [#allocation10], 0 }
   0x6   :  { %22 = vsyncpa [#allocation13], 0 }
   0x7   :  { %23 = vsyncpa [#allocation5], 0 }
   0x8   :  { %25 = vsyncpa [#allocation5 + $0x1], 0  ;;  %s2211_s29 = smov 0   ;;  %s2213_s30 = smov 0  }
   0x9   :  { %s2215_s15 = smov 0   ;;  %s2217_s16 = smov 0  }
   0xa LB: > { %2642 = sst [smem:[#allocation20_spill]] %s2098_s29  ;;  %s2232_s17 = sadd.s32 4294967295, %s2110_s16   ;;  %s2110_s16 = sphi %s2217_s16, %s2672_s16   ;;  %s2106_s15 = sphi %s2215_s15, %s2674_s15   ;;  %s2102_s30 = sphi %s2213_s30, %s2676_s30   ;;  %s2098_s29 = sphi %s2211_s29, %s2675_s29  }
   0xb   : > { %2643 = sst [smem:[#allocation21_spill]] %s2106_s15  ;;  %s1541_s18 = sadd.s32 4294967294, %s2110_s16  }
   0xc   : > { %2644 = sst [smem:[#allocation22_spill]] %s2110_s16  ;;  %s2236_s19 = sadd.s32 1, %s2110_s16  }
   0xd   : > { %2645 = sst [smem:[#allocation23_spill]] %s2236_s19  ;;  %s342_s20 = sadd.s32 1, %s2106_s15 }
   0xe   : > { %s339_s21 = ssub.s32 %s2110_s16, %s2236_s19  ;;  %p352_p0 = scmp.ne.s32.totalorder %s2106_s15, %s2102_s30 }
   0xf   : > { %p340_p1 = scmp.eq.s32.totalorder %s339_s21, 0  ;;  %p353_p2 = scmp.eq.s32.totalorder %s2232_s17, 1 }
  0x10   : > { %p358_p3 = scmp.ne.s32.totalorder %s2102_s30, %s2098_s29  ;;  %p359_p4 = scmp.eq.s32.totalorder %s1541_s18, 1 }
  0x11   : > { %s2247_s22 = scalar_select %p340_p1, %s2106_s15, %s342_s20  }
  0x12   : > { %p2249_p5 = por %p353_p2, %p352_p0  ;;  %p2253_p6 = por %p359_p4, %p358_p3 }
  0x13   : > { %2646 = sst [smem:[#allocation24_spill]] %s2247_s22  ;;  %p1542_p7 = scmp.ge.s32.totalorder %s2110_s16, 1 }
  0x14   : > { %s2647_s23 = scalar_select %p2249_p5, 1, 0 }
  0x15   : > { %s2649_s24 = scalar_select %p2253_p6, 1, 0 }
  0x16   : > { %2648 = sst [smem:[#allocation25_spill]] %s2647_s23  ;;  %p366_p8 = scmp.lt.s32.totalorder %s2110_s16, 3 }
  0x17   : > { %2650 = sst [smem:[#allocation26_spill]] %s2649_s24  ;;  %p2634_p9 = scmp.eq.s32.totalorder %s2232_s17, 0 }
  0x18   : > { %p2260_p10 = pnand %p1542_p7, %p366_p8  ;;  %s2112_s26 = smov [#allocation6]  }
  0x19   : > { %s390_s27 = sshll.u32 %s2112_s26, 4  ;;  %s2113_s28 = smov [#allocation9]   ;;  %s391_s27 = int_to_ptr.vmem [resolvable:$true] %s390_s27 }
  0x1a   : > { %s2651_s25 = scalar_select %p2260_p10, 1, 0 }
  0x1b   : > { %p1739_p11 = pneg %p2260_p10  ;;  %s418_s18 = sshll.u32 %s2113_s28, 4  ;;  %s2272_s18 = int_to_ptr.vmem [resolvable:$true] %s418_s18 }
  0x1c   : > { %s2114_s21 = smov [#allocation3]   ;;  %s2653_s3 = sld [smem:[#allocation27_spill]] }
  0x1d   : > { %p2268_p12 = pnand %p2634_p9, %p1739_p11  ;;  %s379_s22 = sshll.u32 %s2114_s21, 4  ;;  %s2274_s22 = int_to_ptr.vmem [resolvable:$true] %s379_s22 }
  0x1f   : > { %p2284_p0 = pneg %p2268_p12 }
  0x22   : > { %s1864_s26 = scalar_lea.hbm %s2653_s3, 16 }
  0x23   : > { %p1865_p13 = scmp.ne.s32.totalorder %s2653_s3, %s1864_s26  ;;  %p1871_p3 = scmp.lt.u32.totalorder %s1864_s26, %s2653_s3 }
  0x25   : > { %p1867_p1 = pnand %p2284_p0, %p1865_p13 }
  0x27   : > { %p1868_p2 = pneg %p1867_p1 }
  0x29   : > { %p1873_p4 = pnand %p1871_p3, %p1868_p2 }
  0x2b   : > { %1876 = shalt.err (!%p1873_p4)
}
  0x2c   : > { %s1877_s15 = scalar_lea.vmem %s391_s27, 16  ;;  %s1884_s29 = scalar_lea.vmem %s391_s27, 32 }
  0x2d   : > { %p1878_p7 = scmp.ne.s32.totalorder %s391_s27, %s1877_s15  ;;  %p1885_p9 = scmp.lt.s32.totalorder %s391_s27, %s391_s27 }
  0x2e   : > { %p1886_p6 = scmp.lt.s32.totalorder %s1884_s29, %s1877_s15 }
  0x2f   : > { %p1880_p8 = pnand %p1878_p7, %p2284_p0 }
  0x30   : > { %p1887_p5 = por %p1886_p6, %p1885_p9 }
  0x31   : > { %p1881_p11 = pneg %p1880_p8 }
  0x33   : > { %p1888_p10 = pnand %p1887_p5, %p1881_p11 }
  0x35   : > { %1891 = shalt.err (!%p1888_p10)
}
  0x36   : > { %1745 = dma.hbm_to_vmem [thread:$0]  (!%p2268_p12), %s2653_s3, 16, %s391_s27, [#allocation7]  }
  0x37   : > { %s1892_s21 = scalar_lea.hbm %s2620_s7, 16 }
  0x38   : > { %p1893_p13 = scmp.ne.s32.totalorder %s2620_s7, %s1892_s21  ;;  %p1899_p5 = scmp.lt.u32.totalorder %s1892_s21, %s2620_s7 }
  0x3a   : > { %p1895_p1 = pnand %p1893_p13, %p2284_p0 }
  0x3c   : > { %p1896_p6 = pneg %p1895_p1 }
  0x3e   : > { %p1901_p9 = pnand %p1899_p5, %p1896_p6 }
  0x40   : > { %1904 = shalt.err (!%p1901_p9)
}
  0x41   : > { %s1905_s27 = scalar_lea.vmem %s2272_s18, 16  ;;  %s1912_s14 = scalar_lea.vmem %s2272_s18, 32 }
  0x42   : > { %p1906_p10 = scmp.ne.s32.totalorder %s2272_s18, %s1905_s27  ;;  %p1913_p4 = scmp.lt.s32.totalorder %s2272_s18, %s2272_s18 }
  0x43   : > { %p1914_p7 = scmp.lt.s32.totalorder %s1912_s14, %s1905_s27 }
  0x44   : > { %p1908_p2 = pnand %p1906_p10, %p2284_p0 }
  0x45   : > { %p1915_p8 = por %p1914_p7, %p1913_p4 }
  0x46   : > { %p1909_p3 = pneg %p1908_p2 }
  0x48   : > { %p1916_p11 = pnand %p1915_p8, %p1909_p3 }
  0x4a   : > { %1919 = shalt.err (!%p1916_p11)
}
  0x4b   : > { %1751 = dma.hbm_to_vmem [thread:$0]  (!%p2268_p12), %s2620_s7, 16, %s2272_s18, [#allocation10]  }
  0x4c   : > { %s1920_s26 = scalar_lea.hbm %s2615_s2, 16 }
  0x4d   : > { %p1921_p13 = scmp.ne.s32.totalorder %s2615_s2, %s1920_s26  ;;  %p1927_p5 = scmp.lt.u32.totalorder %s1920_s26, %s2615_s2 }
  0x4f   : > { %p1923_p1 = pnand %p1921_p13, %p2284_p0 }
  0x51   : > { %p1924_p6 = pneg %p1923_p1 }
  0x53   : > { %p1929_p9 = pnand %p1927_p5, %p1924_p6 }
  0x55   : > { %1932 = shalt.err (!%p1929_p9)
}
  0x56   : > { %s1933_s18 = scalar_lea.vmem %s2274_s22, 16  ;;  %s1940_s14 = scalar_lea.vmem %s2274_s22, 32 }
  0x57   : > { %p1934_p10 = scmp.ne.s32.totalorder %s2274_s22, %s1933_s18  ;;  %p1941_p4 = scmp.lt.s32.totalorder %s2274_s22, %s2274_s22 }
  0x58   : > { %p1942_p7 = scmp.lt.s32.totalorder %s1940_s14, %s1933_s18 }
  0x59   : > { %p1936_p2 = pnand %p1934_p10, %p2284_p0 }
  0x5a   : > { %p1943_p8 = por %p1942_p7, %p1941_p4 }
  0x5b   : > { %p1937_p3 = pneg %p1936_p2 }
  0x5d   : > { %p1944_p11 = pnand %p1943_p8, %p1937_p3 }
  0x5f   : > { %1947 = shalt.err (!%p1944_p11)
}
  0x60   : > { %1742 = dma.hbm_to_vmem [thread:$0]  (!%p2268_p12), %s2615_s2, 16, %s2274_s22, [#allocation4]  }
  0x61   : > { %s2115_s24 = smov [#allocation8]   ;;  %s2116_s26 = smov [#allocation11]  }
  0x62   : > { %s404_s16 = sshll.u32 %s2115_s24, 4  ;;  %s429_s21 = sshll.u32 %s2116_s26, 4  ;;  %s405_s16 = int_to_ptr.vmem [resolvable:$true] %s404_s16  ;;  %s430_s21 = int_to_ptr.vmem [resolvable:$true] %s429_s21 }
  0x63   : > { %s1948_s27 = scalar_lea.hbm %s2618_s5, 16 }
  0x64   : > { %p1949_p13 = scmp.ne.s32.totalorder %s2618_s5, %s1948_s27  ;;  %p1955_p5 = scmp.lt.u32.totalorder %s1948_s27, %s2618_s5 }
  0x66   : > { %p1951_p1 = pnand %p1949_p13, %p2284_p0 }
  0x68   : > { %p1952_p6 = pneg %p1951_p1 }
  0x6a   : > { %p1957_p9 = pnand %p1955_p5, %p1952_p6 }
  0x6c   : > { %1960 = shalt.err (!%p1957_p9)
}
  0x6d   : > { %s1961_s22 = scalar_lea.vmem %s405_s16, 16  ;;  %s1968_s19 = scalar_lea.vmem %s405_s16, 32 }
  0x6e   : > { %p1962_p10 = scmp.ne.s32.totalorder %s405_s16, %s1961_s22  ;;  %p1969_p4 = scmp.lt.s32.totalorder %s405_s16, %s405_s16 }
  0x6f   : > { %p1970_p7 = scmp.lt.s32.totalorder %s1968_s19, %s1961_s22 }
  0x70   : > { %p1964_p2 = pnand %p1962_p10, %p2284_p0 }
  0x71   : > { %p1971_p8 = por %p1970_p7, %p1969_p4 }
  0x72   : > { %p1965_p3 = pneg %p1964_p2 }
  0x74   : > { %p1972_p11 = pnand %p1971_p8, %p1965_p3 }
  0x76   : > { %1975 = shalt.err (!%p1972_p11)
}
  0x77   : > { %1748 = dma.hbm_to_vmem [thread:$0]  (!%p2268_p12), %s2618_s5, 16, %s405_s16, [#allocation7]  }
  0x78   : > { %s1976_s29 = scalar_lea.hbm %s2621_s8, 16 }
  0x79   : > { %p1977_p13 = scmp.ne.s32.totalorder %s2621_s8, %s1976_s29  ;;  %p1983_p5 = scmp.lt.u32.totalorder %s1976_s29, %s2621_s8 }
  0x7b   : > { %p1979_p1 = pnand %p1977_p13, %p2284_p0 }
  0x7d   : > { %p1980_p6 = pneg %p1979_p1 }
  0x7f   : > { %p1985_p9 = pnand %p1983_p5, %p1980_p6 }
  0x81   : > { %1988 = shalt.err (!%p1985_p9)
}
  0x82   : > { %s1989_s22 = scalar_lea.vmem %s430_s21, 16  ;;  %s1996_s16 = scalar_lea.vmem %s430_s21, 32 }
  0x83   : > { %p1990_p10 = scmp.ne.s32.totalorder %s430_s21, %s1989_s22  ;;  %p1997_p4 = scmp.lt.s32.totalorder %s430_s21, %s430_s21 }
  0x84   : > { %p1998_p7 = scmp.lt.s32.totalorder %s1996_s16, %s1989_s22 }
  0x85   : > { %p1992_p2 = pnand %p1990_p10, %p2284_p0 }
  0x86   : > { %p1999_p8 = por %p1998_p7, %p1997_p4 }
  0x87   : > { %p1993_p3 = pneg %p1992_p2 }
  0x89   : > { %p2000_p11 = pnand %p1999_p8, %p1993_p3 }
  0x8b   : > { %2003 = shalt.err (!%p2000_p11)
}
  0x8c   : > { %1754 = dma.hbm_to_vmem [thread:$0]  (!%p2268_p12), %s2621_s8, 16, %s430_s21, [#allocation10]  }
  0x8d   : > { %s2117_s26 = smov [#allocation12]   ;;  %s2004_s27 = scalar_lea.hbm %s2622_s9, 16 }
  0x8e   : > { %s440_s3 = sshll.u32 %s2117_s26, 4  ;;  %p2005_p13 = scmp.ne.s32.totalorder %s2622_s9, %s2004_s27  ;;  %s441_s3 = int_to_ptr.vmem [resolvable:$true] %s440_s3 }
  0x8f   : > { %p2011_p5 = scmp.lt.u32.totalorder %s2004_s27, %s2622_s9 }
  0x90   : > { %p2007_p1 = pnand %p2005_p13, %p2284_p0 }
  0x92   : > { %p2008_p6 = pneg %p2007_p1 }
  0x94   : > { %p2013_p9 = pnand %p2011_p5, %p2008_p6 }
  0x96   : > { %2016 = shalt.err (!%p2013_p9)
}
  0x97   : > { %s2017_s21 = scalar_lea.vmem %s441_s3, 16  ;;  %s2024_s16 = scalar_lea.vmem %s441_s3, 32 }
  0x98   : > { %p2018_p10 = scmp.ne.s32.totalorder %s441_s3, %s2017_s21  ;;  %p2025_p4 = scmp.lt.s32.totalorder %s441_s3, %s441_s3 }
  0x99   : > { %p2026_p7 = scmp.lt.s32.totalorder %s2024_s16, %s2017_s21 }
  0x9a   : > { %p2020_p2 = pnand %p2018_p10, %p2284_p0 }
  0x9b   : > { %p2027_p8 = por %p2026_p7, %p2025_p4 }
  0x9c   : > { %p2021_p3 = pneg %p2020_p2 }
  0x9e   : > { %p2028_p11 = pnand %p2027_p8, %p2021_p3 }
  0xa0   : > { %2031 = shalt.err (!%p2028_p11)
}
  0xa1   : > { %1757 = dma.hbm_to_vmem [thread:$0]  (!%p2268_p12), %s2622_s9, 16, %s441_s3, [#allocation13]  }
  0xa2   : > { %p2655_p13 = scmp.ne.s32.totalorder %s2651_s25, 0 }
  0xa3   : > { %p2656_p1 = scmp.eq.s32.totalorder (!%p2655_p13), %s2232_s17, 0 }
  0xa4   : > { %478 = sbr.rel (%p2655_p13) target bundleno = 2626 (0xa42), region = 76 }
  0xab   : > { %2077 = dma.done.wait (%p2656_p1), [#allocation4], 16   ;;  %p2657_p0 = pmov %p2656_p1 }
  0xad   : > { %2079 = vsyncadd (%p2657_p0), [#allocation4], 4294967280  ;;  %p2658_p6 = pmov %p2657_p0 }
  0xae   : > { %p2659_p5 = pmov %p2657_p0 }
  0xaf   : > { %2081 = dma.done.wait (%p2658_p6), [#allocation7], 32  }
  0xb0   : > { %2083 = vsyncadd (%p2659_p5), [#allocation7], 4294967264  ;;  %p2660_p9 = pmov %p2657_p0 }
  0xb1   : > { %p2661_p12 = pmov %p2657_p0 }
  0xb2   : > { %2085 = dma.done.wait (%p2660_p9), [#allocation10], 32  }
  0xb3   : > { %2087 = vsyncadd (%p2661_p12), [#allocation10], 4294967264  ;;  %p2662_p10 = pmov %p2657_p0 }
  0xb4   : > { %p2663_p2 = pmov %p2657_p0 }
  0xb5   : > { %2089 = dma.done.wait (%p2662_p10), [#allocation13], 16  }
  0xb6   : > { %2091 = vsyncadd (%p2663_p2), [#allocation13], 4294967280  ;;  %p546_p3 = scmp.lt.s32.totalorder %s2232_s17, 1  ;;  %vm560_vm0 = vcmask 261120   ;;  %v1830_v7 = vld [vmem:[%s2617_s4] sm:$0xff]   ;;  %v2118_v8 = vmov 0.0   ;;  %v665_v43 = vlaneseq }
  0xb7   : > { %1629 = vmatprep.subr.bf16.mxu0 %v2118_v8  ;;  %vm2119_vm1 = vmmov 0   ;;  %v1831_v9 = vld [vmem:[%s2617_s4 + $0x8] sm:$0xff]   ;;  %1637 = vmatprep.subr.bf16.mxu1 %v2118_v8  ;;  %v1559_v19 = vld [vmem:[#allocation3] ss:$0 sm:$0xff]  ;;  %v1560_v21 = vld [vmem:[#allocation6] ss:$0 sm:$0xff] }
  0xb8   : > { %s2422_s25 = scalar_select %p546_p3, %s2232_s17, 1  ;;  %1633 = vmatprep.mubr.msk.bf16.mxu0 %vm2119_vm1, %v2118_v8  ;;  %1630 = vmatpush3.bf16.msra.mxu0 %v1830_v7  ;;  %v1561_v25 = vld [vmem:[#allocation8] ss:$0 sm:$0xff]  ;;  %vm673_vm4 = vcmask 64512   ;;  %v666_v45 = vshrl.u32 %v665_v43, 7  ;;  %vm735_vm6 = vcmask 1043456  }
  0xb9   : > { %1631 = vmatprep.subr.bf16.mxu0 %v2118_v8  ;;  %1639 = vmatprep.mubr.msk.bf16.mxu1 %vm2119_vm1, %v2118_v8  ;;  %s2120_s14 = smov 120   ;;  %s2121_s23 = smov 96   ;;  %v2127_v47 = vmov -1e+09   ;;  %vm782_vm7 = vcmask 60416   ;;  %vm901_vm8 = vcmask 126016  }
  0xba   : > { %s1558_s20 = sshll.u32 %s2422_s25, 3  ;;  %s2122_s22 = smov 88   ;;  %v667_v46 = vsub.s32 0, %v666_v45  ;;  %vm1020_vm9 = vcmask 191616   ;;  %vm1139_vm10 = vcmask 257216   ;;  %vm1353_vm13 = vcmask 523264  }
  0xbb   : > { %s549_s3 = scalar_lea.vmem %s2613_s0, %s1558_s20  ;;  %s2123_s21 = smov 80  }
  0xbc   : > { %v2428_v0 = vld [vmem:[%s549_s3] sm:$0xff]  ;;  %1632 = vmatpush3.bf16.msra.mxu0 %v1831_v9  ;;  %s2124_s16 = smov 112   ;;  %s2125_s19 = smov 72  }
  0xbd   : > { %v561_v1 = vsel %vm560_vm0, %v2428_v0, 0.0  ;;  %1643 = vmatprep.subr.bf16.mxu0 %v2118_v8  ;;  %s2126_s24 = smov 104   ;;  %s552_s26 = scalar_lea.vmem %s2614_s1, %s2422_s25 }
  0xbe   : > { %562 = vadd.xlane.f32.xlu0 %v561_v1  ;;  %v555_v44 = vld [vmem:[%s552_s26] sm:$0x1]  ;;  %s2128_s25 = smov 64   ;;  %s2129_s3 = smov 56  }
  0xbf   : > { %vm556_vm5 = vcmp.gt.f32.partialorder %v555_v44, 0.0  ;;  %s2130_s15 = smov 48   ;;  %s2131_s29 = smov 40  }
  0xc0   : > { %v557_v48 = vsel %vm556_vm5, 0.0, %v2127_v47  ;;  %s2132_s27 = smov 8   ;;  %s2664_s20 = sld [smem:[#allocation25_spill]] }
  0xc1   : > { %v668_v49 = vrot.slane %v557_v48, %v667_v46  ;;  %s1593_s28 = sshll.u32 %s2232_s17, 7 }
  0xc6   : > { %p2667_p7 = scmp.ne.s32.totalorder %s2664_s20, 0 }
 0x14b   : > { %v563_v2 = vpop.xlane.xlu0 %562 }
 0x14c   : > { %v565_v3 = vmul.f32 0.03125, %v563_v2 }
 0x14e   : > { %v566_v4 = vsub.f32 %v2428_v0, %v565_v3 }
 0x150   : > { %v567_v5 = vmul.f32 %v566_v4, %v566_v4 }
 0x152   : > { %v568_v6 = vsel %vm560_vm0, %v567_v5, 0.0 }
 0x153   : > { %569 = vadd.xlane.f32.xlu0 %v568_v6 }
 0x1e0   : > { %v570_v10 = vpop.xlane.xlu0 %569 }
 0x1e1   : > { %v571_v11 = vmul.f32 0.032258064, %v570_v10 }
 0x1e3   : > { %1840 = vrsqrt.f32 %v571_v11  ;;  %vm574_vm2 = vcmp.eq.f32.partialorder %v571_v11, inf  ;;  %v577_v14 = vand.u32 2147483648, %v571_v11  ;;  %vm576_vm3 = vcmp.eq.f32.partialorder %v571_v11, 0.0 }
 0x1ed   : > { %v1841_v12 = vpop.eup %1840 }
 0x1ee   : > { %v573_v13 = vmul.f32 %v1841_v12, %v571_v11 }
 0x1f0   : > { %v575_v15 = vsel %vm574_vm2, %v571_v11, %v573_v13 }
 0x1f1   : > { %v578_v16 = vsel %vm576_vm3, %v577_v14, %v575_v15 }
 0x1f2   : > { %v579_v17 = vadd.f32 1e-06, %v578_v16 }
 0x1f4   : > { %1842 = vrcp.f32 %v579_v17 }
 0x1fe   : > { %v1843_v18 = vpop.eup %1842 }
 0x1ff   : > { %v581_v20 = vmul.f32 %v1843_v18, %v566_v4 }
 0x201   : > { %v588_v22 = vmul.f32 %v1559_v19, %v581_v20 }
 0x203   : > { %v595_v23 = vadd.f32 %v1560_v21, %v588_v22 }
 0x205   : > { %v596_v24 = vpack.c.bf16 %v595_v23, %v595_v23 }
 0x207   : > { %1634 = vmatmul.mubr.msk.bf16.vlgmr.msra.gmra.mrb[0].mxu0 %vm560_vm0, %v596_v24 }
 0x208   : > { %1645 = vmatprep.mubr.msk.bf16.mxu0 %vm2119_vm1, %v2118_v8 }
 0x2da   : > { %v657_v26 = vpop.f32.mrb[0].mxu0 }
 0x2db   : > { %v658_v27 = vadd.f32 %v1561_v25, %v657_v26  ;;  %v1635_v28 = vpop.f32.mrb[1].mxu0 }
 0x2dc   : > { %v660_v29 = vpop.f32.mrb[2].mxu0 }
 0x2dd   : > { %v2451_v30 = vpack.c.bf16 %v658_v27, %v658_v27  ;;  %v1636_v31 = vpop.f32.mrb[3].mxu0 }
 0x2df   : > { %784 = vrot.lane.b32.xlu0 %v2451_v30, %s2120_s14  ;;  %671 = vrot.lane.b32.xlu1 %v2451_v30, %s2121_s23  ;;  %s2135_s23 = smov [#allocation14]  }
 0x2e3   : > { %786 = vrot.lane.b32.xlu1 %v2451_v30, %s2122_s22  ;;  %s2036_s22 = sshll.u32 %s2135_s23, 4  ;;  %s2037_s22 = int_to_ptr.vmem [resolvable:$false] %s2036_s22 }
 0x2e7   : > { %905 = vrot.lane.b32.xlu1 %v2451_v30, %s2123_s21  ;;  %s2133_s21 = smov 16  }
 0x2eb   : > { %903 = vrot.lane.b32.xlu1 %v2451_v30, %s2124_s16  ;;  %s2134_s16 = smov 24  }
 0x2ef   : > { %1024 = vrot.lane.b32.xlu1 %v2451_v30, %s2125_s19 }
 0x2f3   : > { %1022 = vrot.lane.b32.xlu1 %v2451_v30, %s2126_s24 }
 0x351   : > { %v672_v32 = vpop.permute.xlu1 %671  ;;  %v785_v37 = vpop.permute.xlu0 %784 }
 0x352   : > { %v678_v33 = vsel %vm673_vm4, %v672_v32, 0 }
 0x353   : > { %1638 = vmatpush3.bf16.xpose.msra.mxu1 %v678_v33 }
 0x354   : > { %1649 = vmatprep.subr.bf16.mxu1 %v2118_v8 }
 0x355   : > { %v787_v34 = vpop.permute.xlu1 %786 }
 0x356   : > { %v792_v35 = vsel %vm673_vm4, %v787_v34, 0 }
 0x359   : > { %v906_v36 = vpop.permute.xlu1 %905 }
 0x35a   : > { %1640 = vmatmul.mubr.msk.bf16.vlgmr.msra.gmra.mrb[0].mxu1 %vm673_vm4, %v2451_v30  ;;  %v911_v39 = vsel %vm673_vm4, %v906_v36, 0 }
 0x35b   : > { %1650 = vmatpush3.bf16.xpose.msra.mxu1 %v792_v35  ;;  %1651 = vmatprep.mubr.msk.bf16.mxu1 %vm2119_vm1, %v2118_v8 }
 0x35c   : > { %1661 = vmatprep.subr.bf16.mxu1 %v2118_v8 }
 0x35d   : > { %v904_v38 = vpop.permute.xlu1 %903 }
 0x361   : > { %v1025_v40 = vpop.permute.xlu1 %1024 }
 0x362   : > { %1652 = vmatmul.mubr.msk.bf16.vlgmr.msra.gmra.mrb[4].mxu1 %vm673_vm4, %v785_v37  ;;  %v1030_v41 = vsel %vm673_vm4, %v1025_v40, 0 }
 0x363   : > { %1662 = vmatpush3.bf16.xpose.msra.mxu1 %v911_v39  ;;  %1663 = vmatprep.mubr.msk.bf16.mxu1 %vm2119_vm1, %v2118_v8 }
 0x364   : > { %1673 = vmatprep.subr.bf16.mxu1 %v2118_v8 }
 0x365   : > { %v1023_v42 = vpop.permute.xlu1 %1022 }
 0x36a   : > { %1664 = vmatmul.mubr.msk.bf16.vlgmr.msra.gmra.mrb[8].mxu1 %vm673_vm4, %v904_v38 }
 0x36b   : > { %1674 = vmatpush3.bf16.xpose.msra.mxu1 %v1030_v41  ;;  %1675 = vmatprep.mubr.msk.bf16.mxu1 %vm2119_vm1, %v2118_v8 }
 0x36c   : > { %1685 = vmatprep.subr.bf16.mxu1 %v2118_v8 }
 0x372   : > { %1676 = vmatmul.mubr.msk.bf16.vlgmr.msra.gmra.mrb[12].mxu1 %vm673_vm4, %v1023_v42 }
 0x373   : > { %1689 = vmatprep.mubr.msk.bf16.mxu1 %vm2119_vm1, %v2118_v8 }
 0x42d   : > { %v714_v50 = vpop.f32.mrb[0].mxu1 }
 0x42e   : > { %v715_v51 = vadd.f32 %v714_v50, %v668_v49  ;;  %v1641_v52 = vpop.f32.mrb[1].mxu1 }
 0x42f   : > { %v717_v53 = vpop.f32.mrb[2].mxu1 }
 0x430   : > { %v1642_v54 = vpop.f32.mrb[3].mxu1  ;;  %v720_v55 = vsel %vm673_vm4, %v715_v51, -inf }
 0x431   : > { %721 = vmax.xlane.f32.xlu1 %v720_v55 }
 0x435   : > { %v828_v56 = vpop.f32.mrb[4].mxu1 }
 0x436   : > { %v829_v57 = vadd.f32 %v828_v56, %v668_v49  ;;  %v1653_v58 = vpop.f32.mrb[5].mxu1 }
 0x437   : > { %v831_v59 = vpop.f32.mrb[6].mxu1 }
 0x438   : > { %v1654_v60 = vpop.f32.mrb[7].mxu1  ;;  %v834_v61 = vsel %vm673_vm4, %v829_v57, -inf }
 0x439   : > { %835 = vmax.xlane.f32.xlu0 %v834_v61 }
 0x43d   : > { %v947_v62 = vpop.f32.mrb[8].mxu1 }
 0x43e   : > { %v948_v63 = vadd.f32 %v947_v62, %v668_v49  ;;  %v1665_v1 = vpop.f32.mrb[9].mxu1 }
 0x43f   : > { %v950_v2 = vpop.f32.mrb[10].mxu1  ;;  %v1832_v1 = vld [vmem:[%s2619_s6] sm:$0xff]  }
 0x440   : > { %v1666_v3 = vpop.f32.mrb[11].mxu1  ;;  %v953_v11 = vsel %vm673_vm4, %v948_v63, -inf  ;;  %1686 = vmatpush3.bf16.msra.mxu1 %v1832_v1 }
 0x441   : > { %1687 = vmatprep.subr.bf16.mxu1 %v2118_v8 }
 0x442   : > { %730 = vrot.lane.b32.xlu1 %v2451_v30, %s2128_s25 }
 0x445   : > { %v1066_v4 = vpop.f32.mrb[12].mxu1 }
 0x446   : > { %v1067_v5 = vadd.f32 %v1066_v4, %v668_v49  ;;  %v1677_v6 = vpop.f32.mrb[13].mxu1 }
 0x447   : > { %v1069_v7 = vpop.f32.mrb[14].mxu1 }
 0x448   : > { %v1678_v9 = vpop.f32.mrb[15].mxu1  ;;  %v1072_v10 = vsel %vm673_vm4, %v1067_v5, -inf }
 0x449   : > { %1073 = vmax.xlane.f32.xlu0 %v1072_v10 }
 0x45f   : > { %844 = vrot.lane.b32.xlu0 %v2451_v30, %s2129_s3 }
 0x466   : > { %954 = vmax.xlane.f32.xlu1 %v953_v11 }
 0x477   : > { %963 = vrot.lane.b32.xlu1 %v2451_v30, %s2130_s15 }
 0x47b   : > { %1082 = vrot.lane.b32.xlu1 %v2451_v30, %s2131_s29  ;;  %s2665_s29 = sld [smem:[#allocation28_spill]] }
 0x481   : > { %s2570_s18 = scalar_lea.hbm %s2665_s29, %s1593_s28 }
 0x4be   : > { %v722_v12 = vpop.xlane.xlu1 %721 }
 0x4bf   : > { %v723_v13 = vsub.f32 %v715_v51, %v722_v12 }
 0x4c1   : > { %v724_v14 = vmul.f32 1.442695, %v723_v13 }
 0x4c2   : > { %v731_v15 = vpop.permute.xlu1 %730 }
 0x4c3   : > { %1844 = vpow2.f32 %v724_v14  ;;  %v737_v16 = vsel %vm735_vm6, %v731_v15, 0 }
 0x4c4   : > { %1644 = vmatpush3.bf16.msra.mxu0 %v737_v16 }
 0x4c5   : > { %1655 = vmatprep.subr.bf16.mxu0 %v2118_v8 }
 0x4c6   : > { %v836_v17 = vpop.xlane.xlu0 %835 }
 0x4c7   : > { %v837_v18 = vsub.f32 %v829_v57, %v836_v17 }
 0x4c9   : > { %v838_v19 = vmul.f32 1.442695, %v837_v18 }
 0x4cb   : > { %1846 = vpow2.f32 %v838_v19 }
 0x4cd   : > { %v1845_v20 = vpop.eup %1844 }
 0x4ce   : > { %v729_v21 = vpack.c.bf16 %v1845_v20, %v1845_v20  ;;  %v726_v32 = vsel %vm673_vm4, %v1845_v20, 0.0  ;;  %v1576_v20 = vld [vmem:[#allocation9] ss:$0 sm:$0xff] }
 0x4d0   : > { %1646 = vmatmul.mubr.msk.bf16.vlgmr.msra.gmra.mrb[4].mxu0 %vm673_vm4, %v729_v21 }
 0x4d1   : > { %1657 = vmatprep.mubr.msk.bf16.mxu0 %vm2119_vm1, %v2118_v8 }
 0x4d5   : > { %v1847_v22 = vpop.eup %1846 }
 0x4d6   : > { %v1074_v23 = vpop.xlane.xlu0 %1073  ;;  %v840_v24 = vsel %vm673_vm4, %v1847_v22, 0.0  ;;  %v843_v29 = vpack.c.bf16 %v1847_v22, %v1847_v22 }
 0x4d7   : > { %v1075_v25 = vsub.f32 %v1067_v5, %v1074_v23  ;;  %841 = vadd.xlane.f32.xlu0 %v840_v24  ;;  %v1833_v5 = vld [vmem:[%s2619_s6 + $0x8] sm:$0xff]  }
 0x4d8   : > { %1688 = vmatpush3.bf16.msra.mxu1 %v1833_v5 }
 0x4d9   : > { %v1076_v26 = vmul.f32 1.442695, %v1075_v25  ;;  %1701 = vmatprep.subr.bf16.mxu1 %v2118_v8 }
 0x4da   : > { %v845_v27 = vpop.permute.xlu0 %844 }
 0x4db   : > { %1848 = vpow2.f32 %v1076_v26  ;;  %v850_v28 = vsel %vm735_vm6, %v845_v27, 0 }
 0x4dc   : > { %1656 = vmatpush3.bf16.msra.mxu0 %v850_v28 }
 0x4dd   : > { %1667 = vmatprep.subr.bf16.mxu0 %v2118_v8 }
 0x4df   : > { %1658 = vmatmul.mubr.msk.bf16.vlgmr.msra.gmra.mrb[8].mxu0 %vm673_vm4, %v843_v29 }
 0x4e0   : > { %1669 = vmatprep.mubr.msk.bf16.mxu0 %vm2119_vm1, %v2118_v8 }
 0x4e5   : > { %v1849_v30 = vpop.eup %1848 }
 0x4e6   : > { %v1078_v31 = vsel %vm673_vm4, %v1849_v30, 0.0  ;;  %v1081_v43 = vpack.c.bf16 %v1849_v30, %v1849_v30 }
 0x4e7   : > { %1079 = vadd.xlane.f32.xlu0 %v1078_v31 }
 0x4eb   : > { %727 = vadd.xlane.f32.xlu0 %v726_v32 }
 0x4f3   : > { %v955_v33 = vpop.xlane.xlu1 %954 }
 0x4f4   : > { %v956_v34 = vsub.f32 %v948_v63, %v955_v33  ;;  %v1834_v33 = vld [vmem:[%s2623_s10] sm:$0xff]  }
 0x4f6   : > { %v957_v35 = vmul.f32 1.442695, %v956_v34  ;;  %v1836_v34 = vld [vmem:[%s2625_s12] sm:$0xff]  }
 0x4f7   : > { %v964_v36 = vpop.permute.xlu1 %963 }
 0x4f8   : > { %1850 = vpow2.f32 %v957_v35  ;;  %v969_v37 = vsel %vm735_vm6, %v964_v36, 0  ;;  %v1837_v35 = vld [vmem:[%s2625_s12 + $0x8] sm:$0xff]  }
 0x4f9   : > { %1668 = vmatpush3.bf16.msra.mxu0 %v969_v37 }
 0x4fa   : > { %1679 = vmatprep.subr.bf16.mxu0 %v2118_v8 }
 0x4fb   : > { %v1083_v39 = vpop.permute.xlu1 %1082 }
 0x4fc   : > { %v1088_v42 = vsel %vm735_vm6, %v1083_v39, 0 }
 0x502   : > { %v1851_v38 = vpop.eup %1850 }
 0x503   : > { %v959_v40 = vsel %vm673_vm4, %v1851_v38, 0.0  ;;  %v962_v41 = vpack.c.bf16 %v1851_v38, %v1851_v38 }
 0x504   : > { %960 = vadd.xlane.f32.xlu1 %v959_v40 }
 0x505   : > { %1670 = vmatmul.mubr.msk.bf16.vlgmr.msra.gmra.mrb[12].mxu0 %vm673_vm4, %v962_v41 }
 0x506   : > { %1680 = vmatpush3.bf16.msra.mxu0 %v1088_v42  ;;  %1681 = vmatprep.mubr.msk.bf16.mxu0 %vm2119_vm1, %v2118_v8 }
 0x507   : > { %1693 = vmatprep.subr.bf16.mxu0 %v2118_v8 }
 0x50d   : > { %1682 = vmatmul.mubr.msk.bf16.vlgmr.msra.gmra.mrb[16].mxu0 %vm673_vm4, %v1081_v43 }
 0x50e   : > { %1697 = vmatprep.mubr.msk.bf16.mxu0 %vm2119_vm1, %v2118_v8  ;;  %1694 = vmatpush3.bf16.msra.mxu0 %v1834_v33 }
 0x50f   : > { %1695 = vmatprep.subr.bf16.mxu0 %v2118_v8 }
 0x564   : > { %v842_v44 = vpop.xlane.xlu0 %841 }
 0x574   : > { %v1080_v45 = vpop.xlane.xlu0 %1079 }
 0x578   : > { %v728_v46 = vpop.xlane.xlu0 %727 }
 0x579   : > { %1852 = vrcp.f32 %v728_v46 }
 0x57a   : > { %1854 = vrcp.f32 %v842_v44 }
 0x583   : > { %v1853_v47 = vpop.eup %1852 }
 0x584   : > { %v1855_v54 = vpop.eup %1854 }
 0x591   : > { %v961_v61 = vpop.xlane.xlu1 %960 }
 0x592   : > { %1856 = vrcp.f32 %v961_v61 }
 0x593   : > { %1858 = vrcp.f32 %v1080_v45  ;;  %v1580_v45 = vld [vmem:[#allocation11] ss:$0 sm:$0xff] }
 0x59c   : > { %v1857_v62 = vpop.eup %1856 }
 0x59d   : > { %v1859_v9 = vpop.eup %1858 }
 0x5a3   : > { %v773_v48 = vpop.f32.mrb[4].mxu0 }
 0x5a4   : > { %v780_v49 = vmul.f32 %v1853_v47, %v773_v48  ;;  %v1647_v50 = vpop.f32.mrb[5].mxu0  ;;  %v1581_v47 = vld [vmem:[#allocation12] ss:$0 sm:$0xff] }
 0x5a5   : > { %v776_v51 = vpop.f32.mrb[6].mxu0 }
 0x5a6   : > { %v781_v52 = vpack.c.bf16 %v780_v49, %v780_v49  ;;  %v1648_v53 = vpop.f32.mrb[7].mxu0  ;;  %v1838_v51 = vld [vmem:[%s2625_s12 + $0x10] sm:$0xff]  }
 0x5a7   : > { %v1582_v53 = vld [vmem:[%s2624_s11] ss:$0 sm:$0xff] }
 0x5a8   : > { %783 = vst.msk [vmem:[#allocation2] sm:$0xf] %vm782_vm7, %v781_v52  ;;  %v1839_v52 = vld [vmem:[%s2625_s12 + $0x18] sm:$0xff]  }
 0x5b2   : > { %v886_v55 = vpop.f32.mrb[8].mxu0 }
 0x5b3   : > { %v893_v56 = vmul.f32 %v1855_v54, %v886_v55  ;;  %v1659_v57 = vpop.f32.mrb[9].mxu0 }
 0x5b4   : > { %v889_v58 = vpop.f32.mrb[10].mxu0 }
 0x5b5   : > { %v1596_v59 = vpack.c.bf16 %v893_v56, %v893_v56  ;;  %v1660_v60 = vpop.f32.mrb[11].mxu0 }
 0x5b7   : > { %898 = vrot.lane.b32.xlu1 %v1596_v59, %s2132_s27  ;;  %s2666_s27 = smov %s2665_s29 }
 0x5d8   : > { %v1005_v63 = vpop.f32.mrb[12].mxu0 }
 0x5d9   : > { %v1012_v2 = vmul.f32 %v1857_v62, %v1005_v63  ;;  %v1671_v3 = vpop.f32.mrb[13].mxu0 }
 0x5da   : > { %v1008_v4 = vpop.f32.mrb[14].mxu0 }
 0x5db   : > { %v1597_v6 = vpack.c.bf16 %v1012_v2, %v1012_v2  ;;  %v1672_v7 = vpop.f32.mrb[15].mxu0 }
 0x5dd   : > { %1017 = vrot.lane.b32.xlu0 %v1597_v6, %s2133_s21  ;;  %s543_s21 = sand.u32 1, %s2102_s30  }
 0x5de   : > { %s1400_s17 = scalar_lea.sflag [#allocation5], %s543_s21 }
 0x5e0   : > { %v1124_v10 = vpop.f32.mrb[16].mxu0 }
 0x5e1   : > { %v1131_v11 = vmul.f32 %v1859_v9, %v1124_v10  ;;  %v1683_v12 = vpop.f32.mrb[17].mxu0 }
 0x5e2   : > { %v1127_v13 = vpop.f32.mrb[18].mxu0 }
 0x5e3   : > { %v1598_v14 = vpack.c.bf16 %v1131_v11, %v1131_v11  ;;  %v1684_v15 = vpop.f32.mrb[19].mxu0 }
 0x5e5   : > { %1136 = vrot.lane.b32.xlu1 %v1598_v14, %s2134_s16  ;;  %s1557_s16 = sshll.u32 %s543_s21, 3 }
 0x5e6   : > { %s545_s26 = scalar_lea.vmem [#allocation14], %s1557_s16  ;;  %s2038_s16 = scalar_lea.vmem %s2037_s22, 256 }
 0x5e7   : > { %s1413_s25 = sshll.u32 %s545_s26, 4  ;;  %s2572_s25 = int_to_ptr.vmem [resolvable:$true] %s1413_s25 }
 0x5e8   : > { %s2032_s14 = scalar_lea.vmem %s2572_s25, 128  ;;  %p2039_p13 = scmp.lt.s32.totalorder %s2572_s25, %s2037_s22 }
 0x5e9   : > { %p2033_p4 = scmp.ne.s32.totalorder %s2572_s25, %s2032_s14  ;;  %p2040_p1 = scmp.lt.s32.totalorder %s2038_s16, %s2032_s14 }
 0x5eb   : > { %p2034_p8 = pnand %p2033_p4, %p2667_p7  ;;  %p2041_p0 = por %p2040_p1, %p2039_p13 }
 0x5ed   : > { %p2035_p11 = pneg %p2034_p8 }
 0x5ef   : > { %p2042_p6 = pnand %p2041_p0, %p2035_p11 }
 0x629   : > { %v899_v16 = vpop.permute.xlu1 %898 }
 0x62a   : > { %902 = vst.msk [vmem:[#allocation2] sm:$0xf] %vm901_vm8, %v899_v16 }
 0x64f   : > { %v1018_v17 = vpop.permute.xlu0 %1017 }
 0x650   : > { %1021 = vst.msk [vmem:[#allocation2] sm:$0xf] %vm1020_vm9, %v1018_v17 }
 0x657   : > { %v1137_v18 = vpop.permute.xlu1 %1136 }
 0x658   : > { %1140 = vst.msk [vmem:[#allocation2] sm:$0xf] %vm1139_vm10, %v1137_v18 }
 0x65f   : > { %v1141_v19 = vld [vmem:[#allocation2] sm:$0xf] }
 0x660   : > { %1690 = vmatmul.mubr.msk.bf16.vlgmr.msra.gmra.mrb[16].mxu1 %vm560_vm0, %v1141_v19 }
 0x661   : > { %1709 = vmatprep.mubr.msk.bf16.mxu1 %vm2119_vm1, %v2118_v8  ;;  %1702 = vmatpush3.bf16.msra.mxu1 %v1836_v34 }
 0x662   : > { %1703 = vmatprep.subr.bf16.mxu1 %v2118_v8 }
 0x665   : > { %1704 = vmatpush3.bf16.msra.mxu1 %v1837_v35 }
 0x666   : > { %1705 = vmatprep.subr.bf16.mxu1 %v2118_v8 }
 0x669   : > { %1706 = vmatpush3.bf16.msra.mxu1 %v1838_v51 }
 0x66a   : > { %1707 = vmatprep.subr.bf16.mxu1 %v2118_v8  ;;  %v1586_v8 = vld [vmem:[%s2626_s13] ss:$0 sm:$0xff] }
 0x66d   : > { %1708 = vmatpush3.bf16.msra.mxu1 %v1839_v52 }
 0x733   : > { %v1202_v21 = vpop.f32.mrb[16].mxu1 }
 0x734   : > { %v1203_v22 = vadd.f32 %v1576_v20, %v1202_v21  ;;  %v1691_v23 = vpop.f32.mrb[17].mxu1 }
 0x735   : > { %v1205_v24 = vpop.f32.mrb[18].mxu1 }
 0x736   : > { %v2529_v25 = vadd.f32 %v1203_v22, %v2428_v0  ;;  %v1692_v26 = vpop.f32.mrb[19].mxu1  ;;  %v1835_v0 = vld [vmem:[%s2623_s10 + $0x8] sm:$0xff]  }
 0x737   : > { %1696 = vmatpush3.bf16.msra.mxu0 %v1835_v0 }
 0x738   : > { %v1211_v27 = vsel %vm560_vm0, %v2529_v25, 0.0 }
 0x739   : > { %1212 = vadd.xlane.f32.xlu1 %v1211_v27 }
 0x7c6   : > { %v1213_v28 = vpop.xlane.xlu1 %1212 }
 0x7c7   : > { %v1214_v29 = vmul.f32 0.03125, %v1213_v28 }
 0x7c9   : > { %v1215_v30 = vsub.f32 %v2529_v25, %v1214_v29 }
 0x7cb   : > { %v1216_v31 = vmul.f32 %v1215_v30, %v1215_v30 }
 0x7cd   : > { %v1217_v32 = vsel %vm560_vm0, %v1216_v31, 0.0 }
 0x7ce   : > { %1218 = vadd.xlane.f32.xlu0 %v1217_v32 }
 0x85b   : > { %v1219_v36 = vpop.xlane.xlu0 %1218 }
 0x85c   : > { %v1220_v37 = vmul.f32 0.032258064, %v1219_v36 }
 0x85e   : > { %1860 = vrsqrt.f32 %v1220_v37  ;;  %vm1223_vm11 = vcmp.eq.f32.partialorder %v1220_v37, inf  ;;  %v1226_v40 = vand.u32 2147483648, %v1220_v37  ;;  %vm1225_vm12 = vcmp.eq.f32.partialorder %v1220_v37, 0.0 }
 0x868   : > { %v1861_v38 = vpop.eup %1860 }
 0x869   : > { %v1222_v39 = vmul.f32 %v1861_v38, %v1220_v37 }
 0x86b   : > { %v1224_v41 = vsel %vm1223_vm11, %v1220_v37, %v1222_v39 }
 0x86c   : > { %v1227_v42 = vsel %vm1225_vm12, %v1226_v40, %v1224_v41 }
 0x86d   : > { %v1228_v43 = vadd.f32 1e-06, %v1227_v42 }
 0x86f   : > { %1862 = vrcp.f32 %v1228_v43 }
 0x879   : > { %v1863_v44 = vpop.eup %1862 }
 0x87a   : > { %v1230_v46 = vmul.f32 %v1863_v44, %v1215_v30 }
 0x87c   : > { %v1237_v48 = vmul.f32 %v1580_v45, %v1230_v46 }
 0x87e   : > { %v1244_v49 = vadd.f32 %v1581_v47, %v1237_v48 }
 0x880   : > { %v1245_v50 = vpack.c.bf16 %v1244_v49, %v1244_v49 }
 0x882   : > { %1698 = vmatmul.mubr.msk.bf16.vlgmr.msra.gmra.mrb[20].mxu0 %vm560_vm0, %v1245_v50 }
 0x955   : > { %v1306_v54 = vpop.f32.mrb[20].mxu0 }
 0x956   : > { %v1307_v55 = vadd.f32 %v1582_v53, %v1306_v54  ;;  %v1699_v56 = vpop.f32.mrb[21].mxu0 }
 0x957   : > { %v1309_v57 = vpop.f32.mrb[22].mxu0 }
 0x958   : > { %v1312_v58 = vmax.f32 %v1307_v55, 0.0  ;;  %v1700_v59 = vpop.f32.mrb[23].mxu0 }
 0x95a   : > { %v1313_v60 = vpack.c.bf16 %v1312_v58, %v1312_v58 }
 0x95c   : > { %1710 = vmatmul.mubr.msk.bf16.vlgmr.msra.gmra.mrb[20].mxu1 %vm1353_vm13, %v1313_v60 }
 0xa2f   : > { %v1391_v61 = vpop.f32.mrb[20].mxu1 }
 0xa30   : > { %v1392_v62 = vadd.f32 %v1586_v8, %v1391_v61  ;;  %v1711_v63 = vpop.f32.mrb[21].mxu1 }
 0xa31   : > { %v1394_v1 = vpop.f32.mrb[22].mxu1 }
 0xa32   : > { %v1397_v2 = vadd.f32 %v1392_v62, %v2529_v25  ;;  %v1712_v3 = vpop.f32.mrb[23].mxu1 }
 0xa34   : > { %1398 = vst.msk [vmem:[%s545_s26] sm:$0xff] %vm560_vm0, %v1397_v2 }
 0xa35   : > { %2045 = shalt.err (!%p2042_p6)
}
 0xa36   : > { %s2046_s21 = scalar_lea.hbm %s2570_s18, 128  ;;  %s2050_s28 = scalar_lea.hbm %s2666_s27, 256 }
 0xa37   : > { %p2047_p5 = scmp.ne.s32.totalorder %s2570_s18, %s2046_s21  ;;  %p2051_p10 = scmp.lt.u32.totalorder %s2570_s18, %s2666_s27 }
 0xa38   : > { %p2052_p2 = scmp.lt.u32.totalorder %s2050_s28, %s2046_s21  ;;  %p2054_p4 = scmp.lt.u32.totalorder %s2046_s21, %s2570_s18 }
 0xa39   : > { %p2048_p9 = pnand %p2047_p5, %p2667_p7 }
 0xa3a   : > { %p2053_p3 = por %p2052_p2, %p2051_p10 }
 0xa3b   : > { %p2049_p12 = pneg %p2048_p9 }
 0xa3c   : > { %p2055_p8 = por %p2054_p4, %p2053_p3 }
 0xa3e   : > { %p2056_p11 = pnand %p2055_p8, %p2049_p12 }
 0xa40   : > { %2059 = shalt.err (!%p2056_p11)
}
 0xa41   : > { %1737 = dma.vmem_to_hbm [thread:$0]  (%p2667_p7), %s2572_s25, 128, %s2570_s18, %s1400_s17  }
 0xa42 PF: > { %s2668_s15 = sld [smem:[#allocation22_spill]]  ;;  %s2669_s29 = sld [smem:[#allocation20_spill]] }
 0xa43   : > { %s2670_s14 = sld [smem:[#allocation26_spill]] }
 0xa48   : > { %p1774_p13 = scmp.ge.s32.totalorder %s2668_s15, 2  ;;  %s1425_s23 = sand.u32 1, %s2669_s29  }
 0xa49   : > { %p2671_p1 = scmp.ne.s32.totalorder %s2670_s14, 0  ;;  %s1426_s22 = scalar_lea.sflag [#allocation5], %s1425_s23 }
 0xa4b   : > { %p1759_p0 = pnand %p1774_p13, %p2671_p1 }
 0xa4d   : > { %2093 = dma.done.wait (!%p1759_p0), %s1426_s22, 128  }
 0xa4e   : > { %2095 = vsyncadd (!%p1759_p0), %s1426_s22, 4294967168  ;;  %s2672_s16 = sld [smem:[#allocation23_spill]]  ;;  %s2673_s21 = sld [smem:[#allocation21_spill]] }
 0xa4f   : > { %s2674_s15 = sld [smem:[#allocation24_spill]]  ;;  %s2675_s29 = smov %s2102_s30 }
 0xa54   : > { %p28_p6 = scmp.ge.s32.totalorder %s2672_s16, 4   ;;  %s2676_s30 = smov %s2673_s21 }
 0xa56   :  { %30 = sbr.rel (!%p28_p6) target bundleno = 10 (0xa), region = 139 }
 0xa5d   :  { %1431 = vsyncpa [#allocation4], 1 }
 0xa5e   :  { %1433 = vsyncpa [#allocation4 + $0x1], 1 }
 0xa5f   :  { %1434 = vsyncpa [#allocation7], 1 }
 0xa60   :  { %1435 = vsyncpa [#allocation10], 1 }
 0xa61   :  { %1436 = vsyncpa [#allocation13], 1 }
 0xa62   :  { %1437 = vsyncpa [#allocation5], 1 }
 0xa63   :  { %1439 = vsyncpa [#allocation5 + $0x1], 1 }

</bundles_post_ra>
